<compile_context>
chip_gen: v6e
topology: v6e:2x2x1
jax: 0.10.0
libtpu: 0.0.40
codegen_flags: <defaults>
</compile_context>

<pallas_src>
import math
import functools

import jax
import jax.numpy as jnp
from jax import lax
from jax.experimental import pallas as pl
from jax.experimental.pallas import tpu as pltpu


def _mha_kernel(*refs, num_heads, head_dim, q_tile, mode, compute_dtype):
    """One (batch, q-tile) grid step.

    mode: "qkv" (q is k is v), "kv" (k is v), "none" (all distinct).
    K/V (and Q in "qkv" mode) projections are computed once per batch element
    at q-tile 0 and cached in VMEM scratch for the remaining q tiles.
    """
    cd = jnp.dtype(compute_dtype)
    d_model = num_heads * head_dim
    qi = pl.program_id(1)

    if mode == "qkv":
        (x_ref, wqkv_ref, bqkv_ref, wo_ref, bo_ref,
         o_ref, q_scr, k_scr, v_scr, ctx_scr) = refs

        @pl.when(qi == 0)
        def _():
            # One fused (S, D) @ (D, 3D) projection for the whole sequence.
            # 1/sqrt(head_dim) is pre-folded into the Q columns of W/b.
            x = x_ref[0].astype(cd)
            proj = (jnp.dot(x, wqkv_ref[...],
                            preferred_element_type=jnp.float32)
                    + bqkv_ref[...]).astype(cd)
            q_scr[...] = proj[:, :d_model]
            k_scr[...] = proj[:, d_model:2 * d_model]
            v_scr[...] = proj[:, 2 * d_model:]

        start = pl.multiple_of(qi * q_tile, q_tile)
        qp = q_scr[pl.ds(start, q_tile), :]                  # (TQ, D)
    elif mode == "kv":
        (xq_ref, xkv_ref, wq_ref, bq_ref, wkv_ref, bkv_ref, wo_ref, bo_ref,
         o_ref, k_scr, v_scr, ctx_scr) = refs

        @pl.when(qi == 0)
        def _():
            xkv = xkv_ref[0].astype(cd)
            kv = (jnp.dot(xkv, wkv_ref[...],
                          preferred_element_type=jnp.float32)
                  + bkv_ref[...]).astype(cd)
            k_scr[...] = kv[:, :d_model]
            v_scr[...] = kv[:, d_model:]

        qp = (jnp.dot(xq_ref[0].astype(cd), wq_ref[...],
                      preferred_element_type=jnp.float32)
              + bq_ref[...]).astype(cd)
    else:  # all distinct
        (xq_ref, xk_ref, xv_ref, wq_ref, bq_ref, wk_ref, bk_ref,
         wv_ref, bv_ref, wo_ref, bo_ref,
         o_ref, k_scr, v_scr, ctx_scr) = refs

        @pl.when(qi == 0)
        def _():
            k_scr[...] = (jnp.dot(xk_ref[0].astype(cd), wk_ref[...],
                                  preferred_element_type=jnp.float32)
                          + bk_ref[...]).astype(cd)
            v_scr[...] = (jnp.dot(xv_ref[0].astype(cd), wv_ref[...],
                                  preferred_element_type=jnp.float32)
                          + bv_ref[...]).astype(cd)

        qp = (jnp.dot(xq_ref[0].astype(cd), wq_ref[...],
                      preferred_element_type=jnp.float32)
              + bq_ref[...]).astype(cd)

    approx_recip = cd != jnp.dtype(jnp.float32)   # exact recip on the f32 path

    # TODO(synk): optional attention `mask` argument not wired through
    # (module default mask=None); padded batches need a mask-aware softmax.
    # TODO(synk): for very long sequences, add an inner KV-tile loop with
    # online softmax (flash style) instead of keeping full (S, D) K/V resident.
    # TODO(synk): for num_heads >= 12, switch this static unroll to
    # lax.fori_loop(..., unroll=2) to bound live (TQ, S) temporaries.
    for h in range(num_heads):
        lo = h * head_dim
        hi = lo + head_dim
        q_h = qp[:, lo:hi]                                   # (TQ, hd)
        k_h = k_scr[:, lo:hi]                                # (S,  hd)
        v_h = v_scr[:, lo:hi]                                # (S,  hd)

        # Q @ K^T without materializing a transpose: contract head_dim of both.
        scores = lax.dot_general(q_h, k_h, (((1,), (1,)), ((), ())),
                                 preferred_element_type=jnp.float32)  # (TQ, S)
        m = jnp.max(scores, axis=-1, keepdims=True)
        e = jnp.exp(scores - m)
        denom = jnp.sum(e, axis=-1, keepdims=True)           # (TQ, 1)

        # Unnormalized P @ V, then normalize the small (TQ, hd) result.
        pv = jnp.dot(e.astype(cd), v_h, preferred_element_type=jnp.float32)
        pv = pv * pl.reciprocal(denom, approx=approx_recip)
        ctx_scr[:, lo:hi] = pv.astype(cd)

    # Single full-width (TQ, D) @ (D, D) output projection (fills MXU depth)
    # instead of H small K=head_dim matmuls.
    out = jnp.dot(ctx_scr[...], wo_ref[...],
                  preferred_element_type=jnp.float32) + bo_ref[...]
    o_ref[0] = out.astype(o_ref.dtype)


def _sublane_multiple(dtype):
    return {4: 8, 2: 16, 1: 32}.get(jnp.dtype(dtype).itemsize, 8)


def _pick_q_tile(seq_len, sublane, max_tile=256):
    """Largest tile <= max_tile dividing seq_len and respecting sublane tiling."""
    if seq_len <= max_tile:
        return seq_len
    for t in range(max_tile, sublane - 1, -1):
        if seq_len % t == 0 and t % sublane == 0:
            return t
    return seq_len


def _estimate_vmem_bytes(mode, s_kv, d, q_tile, in_bytes, out_bytes, cd_bytes):
    """Rough per-kernel VMEM accounting used for the scoped limit."""
    if mode == "qkv":
        act = 2 * s_kv * d * in_bytes
    elif mode == "kv":
        act = 2 * (q_tile + s_kv) * d * in_bytes
    else:
        act = 2 * (q_tile + 2 * s_kv) * d * in_bytes
    # Weights/biases: assume worst-case double buffering (covers the fallback
    # path even though we request Buffered(1)).
    w = 2 * (4 * d * d * cd_bytes + 4 * d * 4)
    out = 2 * q_tile * d * out_bytes
    n_scr = 3 if mode == "qkv" else 2
    scr = (n_scr * s_kv + q_tile) * d * cd_bytes
    # Transients: one-shot (S, 3D) f32 projection, (TQ, S) score/exp matrices,
    # (TQ, D) f32 accumulators.
    tmp = 3 * s_kv * d * 4 + 3 * q_tile * s_kv * 4 + 4 * q_tile * d * 4
    return act + w + out + scr + tmp


def multi_head_attention(q, k, v, params, *, num_heads, compute_dtype=None,
                         q_tile=None, vmem_limit_bytes=None,
                         single_buffer_weights=True):
    """q: (B, Sq, D); k, v: (B, Skv, D). params: dict of (W_t, b), W_t is (d_in, d_out)."""
    B, Sq, D = q.shape
    Skv = k.shape[1]
    assert v.shape == k.shape and k.shape[0] == B and k.shape[2] == D
    assert D % num_heads == 0, "d_model must be divisible by num_heads"
    head_dim = D // num_heads

    if compute_dtype is None:
        # bf16 operands with f32 MXU accumulation by default for f32 inputs.
        compute_dtype = jnp.bfloat16 if q.dtype == jnp.dtype(jnp.float32) else q.dtype
    cd = jnp.dtype(compute_dtype)

    inv_sqrt_dk = 1.0 / math.sqrt(head_dim)

    wq_t, bq = params["w_q"]
    wk_t, bk = params["w_k"]
    wv_t, bv = params["w_v"]
    wo_t, bo = params["w_o"]

    # Fold 1/sqrt(head_dim) into the Q projection (weights AND bias) on the
    # host; cast weights to the compute dtype on the host so the kernel streams
    # half the weight bytes on the bf16 path.  Biases stay f32 (added to the
    # f32 accumulator).
    wq_s = (jnp.asarray(wq_t, jnp.float32) * inv_sqrt_dk).astype(cd)
    bq_s = (jnp.asarray(bq, jnp.float32) * inv_sqrt_dk).reshape(1, D)
    wk_c = jnp.asarray(wk_t).astype(cd)
    wv_c = jnp.asarray(wv_t).astype(cd)
    wo_c = jnp.asarray(wo_t).astype(cd)
    bk_r = jnp.asarray(bk, jnp.float32).reshape(1, D)
    bv_r = jnp.asarray(bv, jnp.float32).reshape(1, D)
    bo_r = jnp.asarray(bo, jnp.float32).reshape(1, D)

    sublane = _sublane_multiple(q.dtype)
    if q_tile is None:
        q_tile = _pick_q_tile(Sq, sublane)
    assert Sq % q_tile == 0
    assert q_tile == Sq or q_tile % sublane == 0, \
        "q_tile must respect the sublane tiling for the input dtype"
    n_q_tiles = Sq // q_tile

    if (q is k) and (k is v):
        mode = "qkv"
    elif k is v:
        mode = "kv"
    else:
        mode = "none"

    if vmem_limit_bytes is None:
        est = _estimate_vmem_bytes(mode, Skv, D, q_tile,
                                   jnp.dtype(q.dtype).itemsize,
                                   jnp.dtype(q.dtype).itemsize,
                                   cd.itemsize)
        # Floor well above the v5e 16 MiB default scoped limit; cap at v7x's
        # 64 MiB physical VMEM so the same number is safe on every generation.
        vmem_limit_bytes = min(max(int(est * 1.25) + (2 << 20), 32 << 20),
                               64 << 20)

    kernel = functools.partial(
        _mha_kernel, num_heads=num_heads, head_dim=head_dim,
        q_tile=q_tile, mode=mode, compute_dtype=cd)

    q_spec = pl.BlockSpec((1, q_tile, D), lambda b, qi: (b, qi, 0))
    kv_spec = pl.BlockSpec((1, Skv, D), lambda b, qi: (b, 0, 0))
    out_spec = pl.BlockSpec((1, q_tile, D), lambda b, qi: (b, qi, 0))

    def _invoke(weight_pipeline_mode):
        def wspec(shape):
            if weight_pipeline_mode is None:
                return pl.BlockSpec(shape, lambda b, qi: (0, 0))
            return pl.BlockSpec(shape, lambda b, qi: (0, 0),
                                pipeline_mode=weight_pipeline_mode)

        if mode == "qkv":
            w_qkv = jnp.concatenate([wq_s, wk_c, wv_c], axis=1)     # (D, 3D)
            b_qkv = jnp.concatenate([bq_s, bk_r, bv_r], axis=1)     # (1, 3D)
            in_specs = [kv_spec,
                        wspec((D, 3 * D)), wspec((1, 3 * D)),
                        wspec((D, D)), wspec((1, D))]
            args = (q, w_qkv, b_qkv, wo_c, bo_r)
            scratch = ([pltpu.VMEM((Skv, D), cd)] * 3
                       + [pltpu.VMEM((q_tile, D), cd)])
        elif mode == "kv":
            w_kv = jnp.concatenate([wk_c, wv_c], axis=1)            # (D, 2D)
            b_kv = jnp.concatenate([bk_r, bv_r], axis=1)            # (1, 2D)
            in_specs = [q_spec, kv_spec,
                        wspec((D, D)), wspec((1, D)),
                        wspec((D, 2 * D)), wspec((1, 2 * D)),
                        wspec((D, D)), wspec((1, D))]
            args = (q, k, wq_s, bq_s, w_kv, b_kv, wo_c, bo_r)
            scratch = ([pltpu.VMEM((Skv, D), cd)] * 2
                       + [pltpu.VMEM((q_tile, D), cd)])
        else:
            in_specs = [q_spec, kv_spec, kv_spec,
                        wspec((D, D)), wspec((1, D)),
                        wspec((D, D)), wspec((1, D)),
                        wspec((D, D)), wspec((1, D)),
                        wspec((D, D)), wspec((1, D))]
            args = (q, k, v, wq_s, bq_s, wk_c, bk_r, wv_c, bv_r, wo_c, bo_r)
            scratch = ([pltpu.VMEM((Skv, D), cd)] * 2
                       + [pltpu.VMEM((q_tile, D), cd)])

        # Batch axis "parallel" (megacore); the q-tile axis is "arbitrary"
        # because later q tiles reuse the K/V projection cached in scratch at
        # qi == 0 for the same batch element.
        # TODO(synk): for B == 1 on v7x, hoist the K/V projection into a small
        # pre-pass pallas_call so both grid axes can stay "parallel".
        return pl.pallas_call(
            kernel,
            out_shape=jax.ShapeDtypeStruct((B, Sq, D), q.dtype),
            grid_spec=pltpu.PrefetchScalarGridSpec(
                num_scalar_prefetch=0,
                grid=(B, n_q_tiles),
                in_specs=in_specs,
                out_specs=out_spec,
                scratch_shapes=scratch,
            ),
            compiler_params=pltpu.CompilerParams(
                dimension_semantics=("parallel", "arbitrary"),
                vmem_limit_bytes=vmem_limit_bytes),
        )(*args)

    if single_buffer_weights:
        try:
            # Weights/biases have constant index maps, so double buffering them
            # buys nothing: request a single VMEM buffer to save space.
            return _invoke(pl.Buffered(1))
        except Exception:
            # Fallback for jax builds that reject pipeline_mode=Buffered(1).
            return _invoke(None)
    return _invoke(None)


def reference_mha(q, k, v, params, *, num_heads):
    """Pure-JAX reference mirroring the PyTorch forward (highest precision)."""
    B, _, D = q.shape
    hd = D // num_heads

    def lin(x, wb):
        w_t, b = wb
        return jnp.dot(x, w_t, precision="highest") + b

    qp = lin(q, params["w_q"])
    kp = lin(k, params["w_k"])
    vp = lin(v, params["w_v"])

    def to_heads(x):
        return x.reshape(B, x.shape[1], num_heads, hd).transpose(0, 2, 1, 3)

    qh, kh, vh = to_heads(qp), to_heads(kp), to_heads(vp)
    scores = jnp.einsum("bhsd,bhtd->bhst", qh, kh,
                        precision="highest") / math.sqrt(hd)
    w = jax.nn.softmax(scores, axis=-1)
    out = jnp.einsum("bhst,bhtd->bhsd", w, vh, precision="highest")
    out = out.transpose(0, 2, 1, 3).reshape(B, -1, D)
    return lin(out, params["w_o"])


if __name__ == "__main__":
    B, S, D, H = 2, 16, 32, 4
    # NOTE: D=32 / head_dim=8 is far below the 128-lane tile; this config only
    # checks correctness.  Tune/benchmark at BERT shapes (S>=128, D>=512).

    key = jax.random.PRNGKey(0)
    keys = jax.random.split(key, 11)

    def init_linear(kw, kb):
        bound = 1.0 / math.sqrt(D)
        w_t = jax.random.uniform(kw, (D, D), jnp.float32, -bound, bound)
        b = jax.random.uniform(kb, (D,), jnp.float32, -bound, bound)
        return w_t, b

    params = {
        "w_q": init_linear(keys[0], keys[1]),
        "w_k": init_linear(keys[2], keys[3]),
        "w_v": init_linear(keys[4], keys[5]),
        "w_o": init_linear(keys[6], keys[7]),
    }

    q = jax.random.normal(keys[8], (B, S, D), jnp.float32)
    k = jax.random.normal(keys[9], (B, S, D), jnp.float32)
    v = jax.random.normal(keys[10], (B, S, D), jnp.float32)

    # 1) Cross-attention, f32 compute, two q tiles per batch element
    #    (exercises the K/V projection cache across the "arbitrary" q axis).
    out = multi_head_attention(q, k, v, params, num_heads=H,
                               compute_dtype=jnp.float32, q_tile=8)
    out = jax.block_until_ready(out)
    ref = reference_mha(q, k, v, params, num_heads=H)
    assert out.shape == (B, S, D)
    assert jnp.allclose(out, ref, atol=2e-2, rtol=2e-2), \
        "mismatch vs reference (general path, f32 compute)"

    # 2) Cross-attention, default bf16 compute path.
    out_bf16 = jax.block_until_ready(
        multi_head_attention(q, k, v, params, num_heads=H))
    assert jnp.allclose(out_bf16, ref, atol=5e-2, rtol=5e-2), \
        "mismatch vs reference (general path, bf16 compute)"

    # 3) Self-attention fast path (single input DMA, fused QKV projection).
    out_self = jax.block_until_ready(
        multi_head_attention(q, q, q, params, num_heads=H,
                             compute_dtype=jnp.float32, q_tile=8))
    ref_self = reference_mha(q, q, q, params, num_heads=H)
    assert jnp.allclose(out_self, ref_self, atol=2e-2, rtol=2e-2), \
        "mismatch vs reference (self-attention path)"

    # 4) Shared-KV fast path (k is v), fused K|V projection.
    out_kv = jax.block_until_ready(
        multi_head_attention(q, k, k, params, num_heads=H,
                             compute_dtype=jnp.float32))
    ref_kv = reference_mha(q, k, k, params, num_heads=H)
    assert jnp.allclose(out_kv, ref_kv, atol=2e-2, rtol=2e-2), \
        "mismatch vs reference (shared-KV path)"

    print("KERNEL_OK")
</pallas_src>

<mosaic_0001>
module attributes {stable_mosaic.version = 11 : i64} {
  func.func @_mha_kernel(%arg0: i32, %arg1: i32, %arg2: memref<1x8x32xf32, #tpu.memory_space<vmem>>, %arg3: memref<1x16x32xf32, #tpu.memory_space<vmem>>, %arg4: memref<1x16x32xf32, #tpu.memory_space<vmem>>, %arg5: memref<32x32xf32, #tpu.memory_space<vmem>>, %arg6: memref<1x32xf32, #tpu.memory_space<vmem>>, %arg7: memref<32x32xf32, #tpu.memory_space<vmem>>, %arg8: memref<1x32xf32, #tpu.memory_space<vmem>>, %arg9: memref<32x32xf32, #tpu.memory_space<vmem>>, %arg10: memref<1x32xf32, #tpu.memory_space<vmem>>, %arg11: memref<32x32xf32, #tpu.memory_space<vmem>>, %arg12: memref<1x32xf32, #tpu.memory_space<vmem>>, %arg13: memref<1x8x32xf32, #tpu.memory_space<vmem>>, %arg14: memref<16x32xf32, #tpu.memory_space<vmem>>, %arg15: memref<16x32xf32, #tpu.memory_space<vmem>>, %arg16: memref<8x32xf32, #tpu.memory_space<vmem>>) attributes {dimension_semantics = [#tpu.dimension_semantics<parallel>, #tpu.dimension_semantics<arbitrary>], iteration_bounds = array<i64: 2, 2>, scalar_prefetch = 0 : i64, scratch_operands = 3 : i64, tpu.core_type = #tpu.core_type<tc>, window_params = [{transform_indices = @transform_0, window_bounds = array<i64: 1, 8, 32>}, {transform_indices = @transform_1, window_bounds = array<i64: 1, 16, 32>}, {transform_indices = @transform_2, window_bounds = array<i64: 1, 16, 32>}, {pipeline_mode = #tpu.pipeline_mode<synchronous>, transform_indices = @transform_3, window_bounds = array<i64: 32, 32>}, {pipeline_mode = #tpu.pipeline_mode<synchronous>, transform_indices = @transform_4, window_bounds = array<i64: 1, 32>}, {pipeline_mode = #tpu.pipeline_mode<synchronous>, transform_indices = @transform_5, window_bounds = array<i64: 32, 32>}, {pipeline_mode = #tpu.pipeline_mode<synchronous>, transform_indices = @transform_6, window_bounds = array<i64: 1, 32>}, {pipeline_mode = #tpu.pipeline_mode<synchronous>, transform_indices = @transform_7, window_bounds = array<i64: 32, 32>}, {pipeline_mode = #tpu.pipeline_mode<synchronous>, transform_indices = @transform_8, window_bounds = array<i64: 1, 32>}, {pipeline_mode = #tpu.pipeline_mode<synchronous>, transform_indices = @transform_9, window_bounds = array<i64: 32, 32>}, {pipeline_mode = #tpu.pipeline_mode<synchronous>, transform_indices = @transform_10, window_bounds = array<i64: 1, 32>}, {transform_indices = @transform_11, window_bounds = array<i64: 1, 8, 32>}]} {
    %c0_i32 = arith.constant 0 : i32
    %0 = arith.cmpi eq, %arg1, %c0_i32 : i32
    %1 = arith.extui %0 : i1 to i32
    %c0_i32_0 = arith.constant 0 : i32
    %2 = arith.cmpi ne, %1, %c0_i32_0 : i32
    scf.if %2 {
      %c0_54 = arith.constant 0 : index
      %c0_55 = arith.constant 0 : index
      %c0_56 = arith.constant 0 : index
      %83 = vector.load %arg3[%c0_54, %c0_55, %c0_56] : memref<1x16x32xf32, #tpu.memory_space<vmem>>, vector<1x16x32xf32>
      %84 = vector.shape_cast %83 : vector<1x16x32xf32> to vector<16x32xf32>
      %c0_57 = arith.constant 0 : index
      %c0_58 = arith.constant 0 : index
      %85 = vector.load %arg7[%c0_57, %c0_58] : memref<32x32xf32, #tpu.memory_space<vmem>>, vector<32x32xf32>
      %cst_59 = arith.constant dense<0.000000e+00> : vector<16x32xf32>
      %86 = tpu.matmul %84, %85, %cst_59 {dimension_numbers = #tpu.dot_dimension_numbers<[1], [0], [0], [1], [0, 0, 1, 1], [], []>} : vector<16x32xf32>, vector<32x32xf32>, vector<16x32xf32> -> vector<16x32xf32>
      %c0_60 = arith.constant 0 : index
      %c0_61 = arith.constant 0 : index
      %87 = vector.load %arg8[%c0_60, %c0_61] : memref<1x32xf32, #tpu.memory_space<vmem>>, vector<1x32xf32>
      %88 = vector.broadcast %87 : vector<1x32xf32> to vector<16x32xf32>
      %89 = arith.addf %86, %88 : vector<16x32xf32>
      %c0_62 = arith.constant 0 : index
      %c0_63 = arith.constant 0 : index
      %90 = vector.load %arg14[%c0_62, %c0_63] : memref<16x32xf32, #tpu.memory_space<vmem>>, vector<16x32xf32>
      tpu.vector_store %arg14[%c0_62, %c0_63], %89 {strides = array<i32>} : memref<16x32xf32, #tpu.memory_space<vmem>>, vector<16x32xf32>,
      %c0_64 = arith.constant 0 : index
      %c0_65 = arith.constant 0 : index
      %c0_66 = arith.constant 0 : index
      %91 = vector.load %arg4[%c0_64, %c0_65, %c0_66] : memref<1x16x32xf32, #tpu.memory_space<vmem>>, vector<1x16x32xf32>
      %92 = vector.shape_cast %91 : vector<1x16x32xf32> to vector<16x32xf32>
      %c0_67 = arith.constant 0 : index
      %c0_68 = arith.constant 0 : index
      %93 = vector.load %arg9[%c0_67, %c0_68] : memref<32x32xf32, #tpu.memory_space<vmem>>, vector<32x32xf32>
      %cst_69 = arith.constant dense<0.000000e+00> : vector<16x32xf32>
      %94 = tpu.matmul %92, %93, %cst_69 {dimension_numbers = #tpu.dot_dimension_numbers<[1], [0], [0], [1], [0, 0, 1, 1], [], []>} : vector<16x32xf32>, vector<32x32xf32>, vector<16x32xf32> -> vector<16x32xf32>
      %c0_70 = arith.constant 0 : index
      %c0_71 = arith.constant 0 : index
      %95 = vector.load %arg10[%c0_70, %c0_71] : memref<1x32xf32, #tpu.memory_space<vmem>>, vector<1x32xf32>
      %96 = vector.broadcast %95 : vector<1x32xf32> to vector<16x32xf32>
      %97 = arith.addf %94, %96 : vector<16x32xf32>
      %c0_72 = arith.constant 0 : index
      %c0_73 = arith.constant 0 : index
      %98 = vector.load %arg15[%c0_72, %c0_73] : memref<16x32xf32, #tpu.memory_space<vmem>>, vector<16x32xf32>
      tpu.vector_store %arg15[%c0_72, %c0_73], %97 {strides = array<i32>} : memref<16x32xf32, #tpu.memory_space<vmem>>, vector<16x32xf32>,
    } else {
    }
    %c0 = arith.constant 0 : index
    %c0_1 = arith.constant 0 : index
    %c0_2 = arith.constant 0 : index
    %3 = vector.load %arg2[%c0, %c0_1, %c0_2] : memref<1x8x32xf32, #tpu.memory_space<vmem>>, vector<1x8x32xf32>
    %4 = vector.shape_cast %3 : vector<1x8x32xf32> to vector<8x32xf32>
    %c0_3 = arith.constant 0 : index
    %c0_4 = arith.constant 0 : index
    %5 = vector.load %arg5[%c0_3, %c0_4] : memref<32x32xf32, #tpu.memory_space<vmem>>, vector<32x32xf32>
    %cst = arith.constant dense<0.000000e+00> : vector<8x32xf32>
    %6 = tpu.matmul %4, %5, %cst {dimension_numbers = #tpu.dot_dimension_numbers<[1], [0], [0], [1], [0, 0, 1, 1], [], []>} : vector<8x32xf32>, vector<32x32xf32>, vector<8x32xf32> -> vector<8x32xf32>
    %c0_5 = arith.constant 0 : index
    %c0_6 = arith.constant 0 : index
    %7 = vector.load %arg6[%c0_5, %c0_6] : memref<1x32xf32, #tpu.memory_space<vmem>>, vector<1x32xf32>
    %8 = vector.broadcast %7 : vector<1x32xf32> to vector<8x32xf32>
    %9 = arith.addf %6, %8 : vector<8x32xf32>
    %10 = vector.extract_strided_slice %9 {offsets = [0, 0], sizes = [8, 8], strides = [1, 1]} : vector<8x32xf32> to vector<8x8xf32>
    %c0_7 = arith.constant 0 : index
    %c0_8 = arith.constant 0 : index
    %11 = vector.load %arg14[%c0_7, %c0_8] : memref<16x32xf32, #tpu.memory_space<vmem>>, vector<16x8xf32>
    %c0_9 = arith.constant 0 : index
    %c0_10 = arith.constant 0 : index
    %12 = vector.load %arg15[%c0_9, %c0_10] : memref<16x32xf32, #tpu.memory_space<vmem>>, vector<16x8xf32>
    %cst_11 = arith.constant dense<0.000000e+00> : vector<8x16xf32>
    %13 = tpu.matmul %10, %11, %cst_11 {dimension_numbers = #tpu.dot_dimension_numbers<[1], [1], [0], [0], [0, 0, 1, 0], [], []>} : vector<8x8xf32>, vector<16x8xf32>, vector<8x16xf32> -> vector<8x16xf32>
    %cst_12 = arith.constant dense<0xFF800000> : vector<8xf32>
    %14 = vector.multi_reduction <maximumf>, %13, %cst_12 [1] : vector<8x16xf32> to vector<8xf32>
    %15 = vector.shape_cast %14 : vector<8xf32> to vector<8x1xf32>
    %16 = vector.broadcast %15 : vector<8x1xf32> to vector<8x16xf32>
    %17 = arith.subf %13, %16 : vector<8x16xf32>
    %18 = math.exp %17 : vector<8x16xf32>
    %cst_13 = arith.constant dense<0.000000e+00> : vector<8xf32>
    %19 = vector.multi_reduction <add>, %18, %cst_13 [1] : vector<8x16xf32> to vector<8xf32>
    %20 = vector.shape_cast %19 : vector<8xf32> to vector<8x1xf32>
    %cst_14 = arith.constant dense<0.000000e+00> : vector<8x8xf32>
    %21 = tpu.matmul %18, %12, %cst_14 {dimension_numbers = #tpu.dot_dimension_numbers<[1], [0], [0], [1], [0, 0, 1, 1], [], []>} : vector<8x16xf32>, vector<16x8xf32>, vector<8x8xf32> -> vector<8x8xf32>
    %22 = tpu.reciprocal %20 : vector<8x1xf32> -> vector<8x1xf32>
    %23 = vector.broadcast %22 : vector<8x1xf32> to vector<8x8xf32>
    %24 = arith.mulf %21, %23 : vector<8x8xf32>
    %c0_15 = arith.constant 0 : index
    %c0_16 = arith.constant 0 : index
    %25 = vector.load %arg16[%c0_15, %c0_16] : memref<8x32xf32, #tpu.memory_space<vmem>>, vector<8x8xf32>
    tpu.vector_store %arg16[%c0_15, %c0_16], %24 {strides = array<i32>} : memref<8x32xf32, #tpu.memory_space<vmem>>, vector<8x8xf32>,
    %26 = vector.extract_strided_slice %9 {offsets = [0, 8], sizes = [8, 8], strides = [1, 1]} : vector<8x32xf32> to vector<8x8xf32>
    %c0_17 = arith.constant 0 : index
    %c8 = arith.constant 8 : index
    %27 = vector.load %arg14[%c0_17, %c8] : memref<16x32xf32, #tpu.memory_space<vmem>>, vector<16x8xf32>
    %c0_18 = arith.constant 0 : index
    %c8_19 = arith.constant 8 : index
    %28 = vector.load %arg15[%c0_18, %c8_19] : memref<16x32xf32, #tpu.memory_space<vmem>>, vector<16x8xf32>
    %cst_20 = arith.constant dense<0.000000e+00> : vector<8x16xf32>
    %29 = tpu.matmul %26, %27, %cst_20 {dimension_numbers = #tpu.dot_dimension_numbers<[1], [1], [0], [0], [0, 0, 1, 0], [], []>} : vector<8x8xf32>, vector<16x8xf32>, vector<8x16xf32> -> vector<8x16xf32>
    %cst_21 = arith.constant dense<0xFF800000> : vector<8xf32>
    %30 = vector.multi_reduction <maximumf>, %29, %cst_21 [1] : vector<8x16xf32> to vector<8xf32>
    %31 = vector.shape_cast %30 : vector<8xf32> to vector<8x1xf32>
    %32 = vector.broadcast %31 : vector<8x1xf32> to vector<8x16xf32>
    %33 = arith.subf %29, %32 : vector<8x16xf32>
    %34 = math.exp %33 : vector<8x16xf32>
    %cst_22 = arith.constant dense<0.000000e+00> : vector<8xf32>
    %35 = vector.multi_reduction <add>, %34, %cst_22 [1] : vector<8x16xf32> to vector<8xf32>
    %36 = vector.shape_cast %35 : vector<8xf32> to vector<8x1xf32>
    %cst_23 = arith.constant dense<0.000000e+00> : vector<8x8xf32>
    %37 = tpu.matmul %34, %28, %cst_23 {dimension_numbers = #tpu.dot_dimension_numbers<[1], [0], [0], [1], [0, 0, 1, 1], [], []>} : vector<8x16xf32>, vector<16x8xf32>, vector<8x8xf32> -> vector<8x8xf32>
    %38 = tpu.reciprocal %36 : vector<8x1xf32> -> vector<8x1xf32>
    %39 = vector.broadcast %38 : vector<8x1xf32> to vector<8x8xf32>
    %40 = arith.mulf %37, %39 : vector<8x8xf32>
    %c0_24 = arith.constant 0 : index
    %c8_25 = arith.constant 8 : index
    %41 = vector.load %arg16[%c0_24, %c8_25] : memref<8x32xf32, #tpu.memory_space<vmem>>, vector<8x8xf32>
    tpu.vector_store %arg16[%c0_24, %c8_25], %40 {strides = array<i32>} : memref<8x32xf32, #tpu.memory_space<vmem>>, vector<8x8xf32>,
    %42 = vector.extract_strided_slice %9 {offsets = [0, 16], sizes = [8, 8], strides = [1, 1]} : vector<8x32xf32> to vector<8x8xf32>
    %c0_26 = arith.constant 0 : index
    %c16 = arith.constant 16 : index
    %43 = vector.load %arg14[%c0_26, %c16] : memref<16x32xf32, #tpu.memory_space<vmem>>, vector<16x8xf32>
    %c0_27 = arith.constant 0 : index
    %c16_28 = arith.constant 16 : index
    %44 = vector.load %arg15[%c0_27, %c16_28] : memref<16x32xf32, #tpu.memory_space<vmem>>, vector<16x8xf32>
    %cst_29 = arith.constant dense<0.000000e+00> : vector<8x16xf32>
    %45 = tpu.matmul %42, %43, %cst_29 {dimension_numbers = #tpu.dot_dimension_numbers<[1], [1], [0], [0], [0, 0, 1, 0], [], []>} : vector<8x8xf32>, vector<16x8xf32>, vector<8x16xf32> -> vector<8x16xf32>
    %cst_30 = arith.constant dense<0xFF800000> : vector<8xf32>
    %46 = vector.multi_reduction <maximumf>, %45, %cst_30 [1] : vector<8x16xf32> to vector<8xf32>
    %47 = vector.shape_cast %46 : vector<8xf32> to vector<8x1xf32>
    %48 = vector.broadcast %47 : vector<8x1xf32> to vector<8x16xf32>
    %49 = arith.subf %45, %48 : vector<8x16xf32>
    %50 = math.exp %49 : vector<8x16xf32>
    %cst_31 = arith.constant dense<0.000000e+00> : vector<8xf32>
    %51 = vector.multi_reduction <add>, %50, %cst_31 [1] : vector<8x16xf32> to vector<8xf32>
    %52 = vector.shape_cast %51 : vector<8xf32> to vector<8x1xf32>
    %cst_32 = arith.constant dense<0.000000e+00> : vector<8x8xf32>
    %53 = tpu.matmul %50, %44, %cst_32 {dimension_numbers = #tpu.dot_dimension_numbers<[1], [0], [0], [1], [0, 0, 1, 1], [], []>} : vector<8x16xf32>, vector<16x8xf32>, vector<8x8xf32> -> vector<8x8xf32>
    %54 = tpu.reciprocal %52 : vector<8x1xf32> -> vector<8x1xf32>
    %55 = vector.broadcast %54 : vector<8x1xf32> to vector<8x8xf32>
    %56 = arith.mulf %53, %55 : vector<8x8xf32>
    %c0_33 = arith.constant 0 : index
    %c16_34 = arith.constant 16 : index
    %57 = vector.load %arg16[%c0_33, %c16_34] : memref<8x32xf32, #tpu.memory_space<vmem>>, vector<8x8xf32>
    tpu.vector_store %arg16[%c0_33, %c16_34], %56 {strides = array<i32>} : memref<8x32xf32, #tpu.memory_space<vmem>>, vector<8x8xf32>,
    %58 = vector.extract_strided_slice %9 {offsets = [0, 24], sizes = [8, 8], strides = [1, 1]} : vector<8x32xf32> to vector<8x8xf32>
    %c0_35 = arith.constant 0 : index
    %c24 = arith.constant 24 : index
    %59 = vector.load %arg14[%c0_35, %c24] : memref<16x32xf32, #tpu.memory_space<vmem>>, vector<16x8xf32>
    %c0_36 = arith.constant 0 : index
    %c24_37 = arith.constant 24 : index
    %60 = vector.load %arg15[%c0_36, %c24_37] : memref<16x32xf32, #tpu.memory_space<vmem>>, vector<16x8xf32>
    %cst_38 = arith.constant dense<0.000000e+00> : vector<8x16xf32>
    %61 = tpu.matmul %58, %59, %cst_38 {dimension_numbers = #tpu.dot_dimension_numbers<[1], [1], [0], [0], [0, 0, 1, 0], [], []>} : vector<8x8xf32>, vector<16x8xf32>, vector<8x16xf32> -> vector<8x16xf32>
    %cst_39 = arith.constant dense<0xFF800000> : vector<8xf32>
    %62 = vector.multi_reduction <maximumf>, %61, %cst_39 [1] : vector<8x16xf32> to vector<8xf32>
    %63 = vector.shape_cast %62 : vector<8xf32> to vector<8x1xf32>
    %64 = vector.broadcast %63 : vector<8x1xf32> to vector<8x16xf32>
    %65 = arith.subf %61, %64 : vector<8x16xf32>
    %66 = math.exp %65 : vector<8x16xf32>
    %cst_40 = arith.constant dense<0.000000e+00> : vector<8xf32>
    %67 = vector.multi_reduction <add>, %66, %cst_40 [1] : vector<8x16xf32> to vector<8xf32>
    %68 = vector.shape_cast %67 : vector<8xf32> to vector<8x1xf32>
    %cst_41 = arith.constant dense<0.000000e+00> : vector<8x8xf32>
    %69 = tpu.matmul %66, %60, %cst_41 {dimension_numbers = #tpu.dot_dimension_numbers<[1], [0], [0], [1], [0, 0, 1, 1], [], []>} : vector<8x16xf32>, vector<16x8xf32>, vector<8x8xf32> -> vector<8x8xf32>
    %70 = tpu.reciprocal %68 : vector<8x1xf32> -> vector<8x1xf32>
    %71 = vector.broadcast %70 : vector<8x1xf32> to vector<8x8xf32>
    %72 = arith.mulf %69, %71 : vector<8x8xf32>
    %c0_42 = arith.constant 0 : index
    %c24_43 = arith.constant 24 : index
    %73 = vector.load %arg16[%c0_42, %c24_43] : memref<8x32xf32, #tpu.memory_space<vmem>>, vector<8x8xf32>
    tpu.vector_store %arg16[%c0_42, %c24_43], %72 {strides = array<i32>} : memref<8x32xf32, #tpu.memory_space<vmem>>, vector<8x8xf32>,
    %c0_44 = arith.constant 0 : index
    %c0_45 = arith.constant 0 : index
    %74 = vector.load %arg16[%c0_44, %c0_45] : memref<8x32xf32, #tpu.memory_space<vmem>>, vector<8x32xf32>
    %c0_46 = arith.constant 0 : index
    %c0_47 = arith.constant 0 : index
    %75 = vector.load %arg11[%c0_46, %c0_47] : memref<32x32xf32, #tpu.memory_space<vmem>>, vector<32x32xf32>
    %cst_48 = arith.constant dense<0.000000e+00> : vector<8x32xf32>
    %76 = tpu.matmul %74, %75, %cst_48 {dimension_numbers = #tpu.dot_dimension_numbers<[1], [0], [0], [1], [0, 0, 1, 1], [], []>} : vector<8x32xf32>, vector<32x32xf32>, vector<8x32xf32> -> vector<8x32xf32>
    %c0_49 = arith.constant 0 : index
    %c0_50 = arith.constant 0 : index
    %77 = vector.load %arg12[%c0_49, %c0_50] : memref<1x32xf32, #tpu.memory_space<vmem>>, vector<1x32xf32>
    %78 = vector.broadcast %77 : vector<1x32xf32> to vector<8x32xf32>
    %79 = arith.addf %76, %78 : vector<8x32xf32>
    %c0_51 = arith.constant 0 : index
    %c0_52 = arith.constant 0 : index
    %c0_53 = arith.constant 0 : index
    %80 = vector.load %arg13[%c0_51, %c0_52, %c0_53] : memref<1x8x32xf32, #tpu.memory_space<vmem>>, vector<1x8x32xf32>
    %81 = vector.shape_cast %80 : vector<1x8x32xf32> to vector<8x32xf32>
    %82 = vector.shape_cast %79 : vector<8x32xf32> to vector<1x8x32xf32>
    tpu.vector_store %arg13[%c0_51, %c0_52, %c0_53], %82 {strides = array<i32>} : memref<1x8x32xf32, #tpu.memory_space<vmem>>, vector<1x8x32xf32>,
    return
  }
  func.func @transform_0(%arg0: i32, %arg1: i32) -> (i32, i32, i32) {
    %c0_i32 = arith.constant 0 : i32
    %c0_i32_0 = arith.constant 0 : i32
    return %arg0, %arg1, %c0_i32 : i32, i32, i32
  }
  func.func @transform_1(%arg0: i32, %arg1: i32) -> (i32, i32, i32) {
    %c0_i32 = arith.constant 0 : i32
    %c0_i32_0 = arith.constant 0 : i32
    %c0_i32_1 = arith.constant 0 : i32
    return %arg0, %c0_i32, %c0_i32_0 : i32, i32, i32
  }
  func.func @transform_2(%arg0: i32, %arg1: i32) -> (i32, i32, i32) {
    %c0_i32 = arith.constant 0 : i32
    %c0_i32_0 = arith.constant 0 : i32
    %c0_i32_1 = arith.constant 0 : i32
    return %arg0, %c0_i32, %c0_i32_0 : i32, i32, i32
  }
  func.func @transform_3(%arg0: i32, %arg1: i32) -> (i32, i32) {
    %c0_i32 = arith.constant 0 : i32
    %c0_i32_0 = arith.constant 0 : i32
    %c0_i32_1 = arith.constant 0 : i32
    return %c0_i32, %c0_i32_0 : i32, i32
  }
  func.func @transform_4(%arg0: i32, %arg1: i32) -> (i32, i32) {
    %c0_i32 = arith.constant 0 : i32
    %c0_i32_0 = arith.constant 0 : i32
    %c0_i32_1 = arith.constant 0 : i32
    return %c0_i32, %c0_i32_0 : i32, i32
  }
  func.func @transform_5(%arg0: i32, %arg1: i32) -> (i32, i32) {
    %c0_i32 = arith.constant 0 : i32
    %c0_i32_0 = arith.constant 0 : i32
    %c0_i32_1 = arith.constant 0 : i32
    return %c0_i32, %c0_i32_0 : i32, i32
  }
  func.func @transform_6(%arg0: i32, %arg1: i32) -> (i32, i32) {
    %c0_i32 = arith.constant 0 : i32
    %c0_i32_0 = arith.constant 0 : i32
    %c0_i32_1 = arith.constant 0 : i32
    return %c0_i32, %c0_i32_0 : i32, i32
  }
  func.func @transform_7(%arg0: i32, %arg1: i32) -> (i32, i32) {
    %c0_i32 = arith.constant 0 : i32
    %c0_i32_0 = arith.constant 0 : i32
    %c0_i32_1 = arith.constant 0 : i32
    return %c0_i32, %c0_i32_0 : i32, i32
  }
  func.func @transform_8(%arg0: i32, %arg1: i32) -> (i32, i32) {
    %c0_i32 = arith.constant 0 : i32
    %c0_i32_0 = arith.constant 0 : i32
    %c0_i32_1 = arith.constant 0 : i32
    return %c0_i32, %c0_i32_0 : i32, i32
  }
  func.func @transform_9(%arg0: i32, %arg1: i32) -> (i32, i32) {
    %c0_i32 = arith.constant 0 : i32
    %c0_i32_0 = arith.constant 0 : i32
    %c0_i32_1 = arith.constant 0 : i32
    return %c0_i32, %c0_i32_0 : i32, i32
  }
  func.func @transform_10(%arg0: i32, %arg1: i32) -> (i32, i32) {
    %c0_i32 = arith.constant 0 : i32
    %c0_i32_0 = arith.constant 0 : i32
    %c0_i32_1 = arith.constant 0 : i32
    return %c0_i32, %c0_i32_0 : i32, i32
  }
  func.func @transform_11(%arg0: i32, %arg1: i32) -> (i32, i32, i32) {
    %c0_i32 = arith.constant 0 : i32
    %c0_i32_0 = arith.constant 0 : i32
    return %arg0, %arg1, %c0_i32 : i32, i32, i32
  }
}

module attributes {stable_mosaic.version = 11 : i64} {
  func.func @_mha_kernel(%arg0: i32, %arg1: i32, %arg2: memref<1x8x32xf32, #tpu.memory_space<vmem>>, %arg3: memref<1x16x32xf32, #tpu.memory_space<vmem>>, %arg4: memref<1x16x32xf32, #tpu.memory_space<vmem>>, %arg5: memref<32x32xf32, #tpu.memory_space<vmem>>, %arg6: memref<1x32xf32, #tpu.memory_space<vmem>>, %arg7: memref<32x32xf32, #tpu.memory_space<vmem>>, %arg8: memref<1x32xf32, #tpu.memory_space<vmem>>, %arg9: memref<32x32xf32, #tpu.memory_space<vmem>>, %arg10: memref<1x32xf32, #tpu.memory_space<vmem>>, %arg11: memref<32x32xf32, #tpu.memory_space<vmem>>, %arg12: memref<1x32xf32, #tpu.memory_space<vmem>>, %arg13: memref<1x8x32xf32, #tpu.memory_space<vmem>>, %arg14: memref<16x32xf32, #tpu.memory_space<vmem>>, %arg15: memref<16x32xf32, #tpu.memory_space<vmem>>, %arg16: memref<8x32xf32, #tpu.memory_space<vmem>>) attributes {dimension_semantics = [#tpu.dimension_semantics<parallel>, #tpu.dimension_semantics<arbitrary>], iteration_bounds = array<i64: 2, 2>, scalar_prefetch = 0 : i64, scratch_operands = 3 : i64, tpu.core_type = #tpu.core_type<tc>, window_params = [{transform_indices = @transform_0, window_bounds = array<i64: 1, 8, 32>}, {transform_indices = @transform_1, window_bounds = array<i64: 1, 16, 32>}, {transform_indices = @transform_2, window_bounds = array<i64: 1, 16, 32>}, {pipeline_mode = #tpu.pipeline_mode<synchronous>, transform_indices = @transform_3, window_bounds = array<i64: 32, 32>}, {pipeline_mode = #tpu.pipeline_mode<synchronous>, transform_indices = @transform_4, window_bounds = array<i64: 1, 32>}, {pipeline_mode = #tpu.pipeline_mode<synchronous>, transform_indices = @transform_5, window_bounds = array<i64: 32, 32>}, {pipeline_mode = #tpu.pipeline_mode<synchronous>, transform_indices = @transform_6, window_bounds = array<i64: 1, 32>}, {pipeline_mode = #tpu.pipeline_mode<synchronous>, transform_indices = @transform_7, window_bounds = array<i64: 32, 32>}, {pipeline_mode = #tpu.pipeline_mode<synchronous>, transform_indices = @transform_8, window_bounds = array<i64: 1, 32>}, {pipeline_mode = #tpu.pipeline_mode<synchronous>, transform_indices = @transform_9, window_bounds = array<i64: 32, 32>}, {pipeline_mode = #tpu.pipeline_mode<synchronous>, transform_indices = @transform_10, window_bounds = array<i64: 1, 32>}, {transform_indices = @transform_11, window_bounds = array<i64: 1, 8, 32>}]} {
    %c0_i32 = arith.constant 0 : i32
    %0 = arith.cmpi eq, %arg1, %c0_i32 : i32
    %1 = arith.extui %0 : i1 to i32
    %c0_i32_0 = arith.constant 0 : i32
    %2 = arith.cmpi ne, %1, %c0_i32_0 : i32
    scf.if %2 {
      %c0_54 = arith.constant 0 : index
      %c0_55 = arith.constant 0 : index
      %c0_56 = arith.constant 0 : index
      %83 = vector.load %arg3[%c0_54, %c0_55, %c0_56] : memref<1x16x32xf32, #tpu.memory_space<vmem>>, vector<1x16x32xf32>
      %84 = vector.shape_cast %83 : vector<1x16x32xf32> to vector<16x32xf32>
      %c0_57 = arith.constant 0 : index
      %c0_58 = arith.constant 0 : index
      %85 = vector.load %arg7[%c0_57, %c0_58] : memref<32x32xf32, #tpu.memory_space<vmem>>, vector<32x32xf32>
      %cst_59 = arith.constant dense<0.000000e+00> : vector<16x32xf32>
      %86 = tpu.matmul %84, %85, %cst_59 {dimension_numbers = #tpu.dot_dimension_numbers<[1], [0], [0], [1], [0, 0, 1, 1], [], []>} : vector<16x32xf32>, vector<32x32xf32>, vector<16x32xf32> -> vector<16x32xf32>
      %c0_60 = arith.constant 0 : index
      %c0_61 = arith.constant 0 : index
      %87 = vector.load %arg8[%c0_60, %c0_61] : memref<1x32xf32, #tpu.memory_space<vmem>>, vector<1x32xf32>
      %88 = vector.broadcast %87 : vector<1x32xf32> to vector<16x32xf32>
      %89 = arith.addf %86, %88 : vector<16x32xf32>
      %c0_62 = arith.constant 0 : index
      %c0_63 = arith.constant 0 : index
      %90 = vector.load %arg14[%c0_62, %c0_63] : memref<16x32xf32, #tpu.memory_space<vmem>>, vector<16x32xf32>
      tpu.vector_store %arg14[%c0_62, %c0_63], %89 {strides = array<i32>} : memref<16x32xf32, #tpu.memory_space<vmem>>, vector<16x32xf32>,
      %c0_64 = arith.constant 0 : index
      %c0_65 = arith.constant 0 : index
      %c0_66 = arith.constant 0 : index
      %91 = vector.load %arg4[%c0_64, %c0_65, %c0_66] : memref<1x16x32xf32, #tpu.memory_space<vmem>>, vector<1x16x32xf32>
      %92 = vector.shape_cast %91 : vector<1x16x32xf32> to vector<16x32xf32>
      %c0_67 = arith.constant 0 : index
      %c0_68 = arith.constant 0 : index
      %93 = vector.load %arg9[%c0_67, %c0_68] : memref<32x32xf32, #tpu.memory_space<vmem>>, vector<32x32xf32>
      %cst_69 = arith.constant dense<0.000000e+00> : vector<16x32xf32>
      %94 = tpu.matmul %92, %93, %cst_69 {dimension_numbers = #tpu.dot_dimension_numbers<[1], [0], [0], [1], [0, 0, 1, 1], [], []>} : vector<16x32xf32>, vector<32x32xf32>, vector<16x32xf32> -> vector<16x32xf32>
      %c0_70 = arith.constant 0 : index
      %c0_71 = arith.constant 0 : index
      %95 = vector.load %arg10[%c0_70, %c0_71] : memref<1x32xf32, #tpu.memory_space<vmem>>, vector<1x32xf32>
      %96 = vector.broadcast %95 : vector<1x32xf32> to vector<16x32xf32>
      %97 = arith.addf %94, %96 : vector<16x32xf32>
      %c0_72 = arith.constant 0 : index
      %c0_73 = arith.constant 0 : index
      %98 = vector.load %arg15[%c0_72, %c0_73] : memref<16x32xf32, #tpu.memory_space<vmem>>, vector<16x32xf32>
      tpu.vector_store %arg15[%c0_72, %c0_73], %97 {strides = array<i32>} : memref<16x32xf32, #tpu.memory_space<vmem>>, vector<16x32xf32>,
    } else {
    }
    %c0 = arith.constant 0 : index
    %c0_1 = arith.constant 0 : index
    %c0_2 = arith.constant 0 : index
    %3 = vector.load %arg2[%c0, %c0_1, %c0_2] : memref<1x8x32xf32, #tpu.memory_space<vmem>>, vector<1x8x32xf32>
    %4 = vector.shape_cast %3 : vector<1x8x32xf32> to vector<8x32xf32>
    %c0_3 = arith.constant 0 : index
    %c0_4 = arith.constant 0 : index
    %5 = vector.load %arg5[%c0_3, %c0_4] : memref<32x32xf32, #tpu.memory_space<vmem>>, vector<32x32xf32>
    %cst = arith.constant dense<0.000000e+00> : vector<8x32xf32>
    %6 = tpu.matmul %4, %5, %cst {dimension_numbers = #tpu.dot_dimension_numbers<[1], [0], [0], [1], [0, 0, 1, 1], [], []>} : vector<8x32xf32>, vector<32x32xf32>, vector<8x32xf32> -> vector<8x32xf32>
    %c0_5 = arith.constant 0 : index
    %c0_6 = arith.constant 0 : index
    %7 = vector.load %arg6[%c0_5, %c0_6] : memref<1x32xf32, #tpu.memory_space<vmem>>, vector<1x32xf32>
    %8 = vector.broadcast %7 : vector<1x32xf32> to vector<8x32xf32>
    %9 = arith.addf %6, %8 : vector<8x32xf32>
    %10 = vector.extract_strided_slice %9 {offsets = [0, 0], sizes = [8, 8], strides = [1, 1]} : vector<8x32xf32> to vector<8x8xf32>
    %c0_7 = arith.constant 0 : index
    %c0_8 = arith.constant 0 : index
    %11 = vector.load %arg14[%c0_7, %c0_8] : memref<16x32xf32, #tpu.memory_space<vmem>>, vector<16x8xf32>
    %c0_9 = arith.constant 0 : index
    %c0_10 = arith.constant 0 : index
    %12 = vector.load %arg15[%c0_9, %c0_10] : memref<16x32xf32, #tpu.memory_space<vmem>>, vector<16x8xf32>
    %cst_11 = arith.constant dense<0.000000e+00> : vector<8x16xf32>
    %13 = tpu.matmul %10, %11, %cst_11 {dimension_numbers = #tpu.dot_dimension_numbers<[1], [1], [0], [0], [0, 0, 1, 0], [], []>} : vector<8x8xf32>, vector<16x8xf32>, vector<8x16xf32> -> vector<8x16xf32>
    %cst_12 = arith.constant dense<0xFF800000> : vector<8xf32>
    %14 = vector.multi_reduction <maximumf>, %13, %cst_12 [1] : vector<8x16xf32> to vector<8xf32>
    %15 = vector.shape_cast %14 : vector<8xf32> to vector<8x1xf32>
    %16 = vector.broadcast %15 : vector<8x1xf32> to vector<8x16xf32>
    %17 = arith.subf %13, %16 : vector<8x16xf32>
    %18 = math.exp %17 : vector<8x16xf32>
    %cst_13 = arith.constant dense<0.000000e+00> : vector<8xf32>
    %19 = vector.multi_reduction <add>, %18, %cst_13 [1] : vector<8x16xf32> to vector<8xf32>
    %20 = vector.shape_cast %19 : vector<8xf32> to vector<8x1xf32>
    %cst_14 = arith.constant dense<0.000000e+00> : vector<8x8xf32>
    %21 = tpu.matmul %18, %12, %cst_14 {dimension_numbers = #tpu.dot_dimension_numbers<[1], [0], [0], [1], [0, 0, 1, 1], [], []>} : vector<8x16xf32>, vector<16x8xf32>, vector<8x8xf32> -> vector<8x8xf32>
    %22 = tpu.reciprocal %20 : vector<8x1xf32> -> vector<8x1xf32>
    %23 = vector.broadcast %22 : vector<8x1xf32> to vector<8x8xf32>
    %24 = arith.mulf %21, %23 : vector<8x8xf32>
    %c0_15 = arith.constant 0 : index
    %c0_16 = arith.constant 0 : index
    %25 = vector.load %arg16[%c0_15, %c0_16] : memref<8x32xf32, #tpu.memory_space<vmem>>, vector<8x8xf32>
    tpu.vector_store %arg16[%c0_15, %c0_16], %24 {strides = array<i32>} : memref<8x32xf32, #tpu.memory_space<vmem>>, vector<8x8xf32>,
    %26 = vector.extract_strided_slice %9 {offsets = [0, 8], sizes = [8, 8], strides = [1, 1]} : vector<8x32xf32> to vector<8x8xf32>
    %c0_17 = arith.constant 0 : index
    %c8 = arith.constant 8 : index
    %27 = vector.load %arg14[%c0_17, %c8] : memref<16x32xf32, #tpu.memory_space<vmem>>, vector<16x8xf32>
    %c0_18 = arith.constant 0 : index
    %c8_19 = arith.constant 8 : index
    %28 = vector.load %arg15[%c0_18, %c8_19] : memref<16x32xf32, #tpu.memory_space<vmem>>, vector<16x8xf32>
    %cst_20 = arith.constant dense<0.000000e+00> : vector<8x16xf32>
    %29 = tpu.matmul %26, %27, %cst_20 {dimension_numbers = #tpu.dot_dimension_numbers<[1], [1], [0], [0], [0, 0, 1, 0], [], []>} : vector<8x8xf32>, vector<16x8xf32>, vector<8x16xf32> -> vector<8x16xf32>
    %cst_21 = arith.constant dense<0xFF800000> : vector<8xf32>
    %30 = vector.multi_reduction <maximumf>, %29, %cst_21 [1] : vector<8x16xf32> to vector<8xf32>
    %31 = vector.shape_cast %30 : vector<8xf32> to vector<8x1xf32>
    %32 = vector.broadcast %31 : vector<8x1xf32> to vector<8x16xf32>
    %33 = arith.subf %29, %32 : vector<8x16xf32>
    %34 = math.exp %33 : vector<8x16xf32>
    %cst_22 = arith.constant dense<0.000000e+00> : vector<8xf32>
    %35 = vector.multi_reduction <add>, %34, %cst_22 [1] : vector<8x16xf32> to vector<8xf32>
    %36 = vector.shape_cast %35 : vector<8xf32> to vector<8x1xf32>
    %cst_23 = arith.constant dense<0.000000e+00> : vector<8x8xf32>
    %37 = tpu.matmul %34, %28, %cst_23 {dimension_numbers = #tpu.dot_dimension_numbers<[1], [0], [0], [1], [0, 0, 1, 1], [], []>} : vector<8x16xf32>, vector<16x8xf32>, vector<8x8xf32> -> vector<8x8xf32>
    %38 = tpu.reciprocal %36 : vector<8x1xf32> -> vector<8x1xf32>
    %39 = vector.broadcast %38 : vector<8x1xf32> to vector<8x8xf32>
    %40 = arith.mulf %37, %39 : vector<8x8xf32>
    %c0_24 = arith.constant 0 : index
    %c8_25 = arith.constant 8 : index
    %41 = vector.load %arg16[%c0_24, %c8_25] : memref<8x32xf32, #tpu.memory_space<vmem>>, vector<8x8xf32>
    tpu.vector_store %arg16[%c0_24, %c8_25], %40 {strides = array<i32>} : memref<8x32xf32, #tpu.memory_space<vmem>>, vector<8x8xf32>,
    %42 = vector.extract_strided_slice %9 {offsets = [0, 16], sizes = [8, 8], strides = [1, 1]} : vector<8x32xf32> to vector<8x8xf32>
    %c0_26 = arith.constant 0 : index
    %c16 = arith.constant 16 : index
    %43 = vector.load %arg14[%c0_26, %c16] : memref<16x32xf32, #tpu.memory_space<vmem>>, vector<16x8xf32>
    %c0_27 = arith.constant 0 : index
    %c16_28 = arith.constant 16 : index
    %44 = vector.load %arg15[%c0_27, %c16_28] : memref<16x32xf32, #tpu.memory_space<vmem>>, vector<16x8xf32>
    %cst_29 = arith.constant dense<0.000000e+00> : vector<8x16xf32>
    %45 = tpu.matmul %42, %43, %cst_29 {dimension_numbers = #tpu.dot_dimension_numbers<[1], [1], [0], [0], [0, 0, 1, 0], [], []>} : vector<8x8xf32>, vector<16x8xf32>, vector<8x16xf32> -> vector<8x16xf32>
    %cst_30 = arith.constant dense<0xFF800000> : vector<8xf32>
    %46 = vector.multi_reduction <maximumf>, %45, %cst_30 [1] : vector<8x16xf32> to vector<8xf32>
    %47 = vector.shape_cast %46 : vector<8xf32> to vector<8x1xf32>
    %48 = vector.broadcast %47 : vector<8x1xf32> to vector<8x16xf32>
    %49 = arith.subf %45, %48 : vector<8x16xf32>
    %50 = math.exp %49 : vector<8x16xf32>
    %cst_31 = arith.constant dense<0.000000e+00> : vector<8xf32>
    %51 = vector.multi_reduction <add>, %50, %cst_31 [1] : vector<8x16xf32> to vector<8xf32>
    %52 = vector.shape_cast %51 : vector<8xf32> to vector<8x1xf32>
    %cst_32 = arith.constant dense<0.000000e+00> : vector<8x8xf32>
    %53 = tpu.matmul %50, %44, %cst_32 {dimension_numbers = #tpu.dot_dimension_numbers<[1], [0], [0], [1], [0, 0, 1, 1], [], []>} : vector<8x16xf32>, vector<16x8xf32>, vector<8x8xf32> -> vector<8x8xf32>
    %54 = tpu.reciprocal %52 : vector<8x1xf32> -> vector<8x1xf32>
    %55 = vector.broadcast %54 : vector<8x1xf32> to vector<8x8xf32>
    %56 = arith.mulf %53, %55 : vector<8x8xf32>
    %c0_33 = arith.constant 0 : index
    %c16_34 = arith.constant 16 : index
    %57 = vector.load %arg16[%c0_33, %c16_34] : memref<8x32xf32, #tpu.memory_space<vmem>>, vector<8x8xf32>
    tpu.vector_store %arg16[%c0_33, %c16_34], %56 {strides = array<i32>} : memref<8x32xf32, #tpu.memory_space<vmem>>, vector<8x8xf32>,
    %58 = vector.extract_strided_slice %9 {offsets = [0, 24], sizes = [8, 8], strides = [1, 1]} : vector<8x32xf32> to vector<8x8xf32>
    %c0_35 = arith.constant 0 : index
    %c24 = arith.constant 24 : index
    %59 = vector.load %arg14[%c0_35, %c24] : memref<16x32xf32, #tpu.memory_space<vmem>>, vector<16x8xf32>
    %c0_36 = arith.constant 0 : index
    %c24_37 = arith.constant 24 : index
    %60 = vector.load %arg15[%c0_36, %c24_37] : memref<16x32xf32, #tpu.memory_space<vmem>>, vector<16x8xf32>
    %cst_38 = arith.constant dense<0.000000e+00> : vector<8x16xf32>
    %61 = tpu.matmul %58, %59, %cst_38 {dimension_numbers = #tpu.dot_dimension_numbers<[1], [1], [0], [0], [0, 0, 1, 0], [], []>} : vector<8x8xf32>, vector<16x8xf32>, vector<8x16xf32> -> vector<8x16xf32>
    %cst_39 = arith.constant dense<0xFF800000> : vector<8xf32>
    %62 = vector.multi_reduction <maximumf>, %61, %cst_39 [1] : vector<8x16xf32> to vector<8xf32>
    %63 = vector.shape_cast %62 : vector<8xf32> to vector<8x1xf32>
    %64 = vector.broadcast %63 : vector<8x1xf32> to vector<8x16xf32>
    %65 = arith.subf %61, %64 : vector<8x16xf32>
    %66 = math.exp %65 : vector<8x16xf32>
    %cst_40 = arith.constant dense<0.000000e+00> : vector<8xf32>
    %67 = vector.multi_reduction <add>, %66, %cst_40 [1] : vector<8x16xf32> to vector<8xf32>
    %68 = vector.shape_cast %67 : vector<8xf32> to vector<8x1xf32>
    %cst_41 = arith.constant dense<0.000000e+00> : vector<8x8xf32>
    %69 = tpu.matmul %66, %60, %cst_41 {dimension_numbers = #tpu.dot_dimension_numbers<[1], [0], [0], [1], [0, 0, 1, 1], [], []>} : vector<8x16xf32>, vector<16x8xf32>, vector<8x8xf32> -> vector<8x8xf32>
    %70 = tpu.reciprocal %68 : vector<8x1xf32> -> vector<8x1xf32>
    %71 = vector.broadcast %70 : vector<8x1xf32> to vector<8x8xf32>
    %72 = arith.mulf %69, %71 : vector<8x8xf32>
    %c0_42 = arith.constant 0 : index
    %c24_43 = arith.constant 24 : index
    %73 = vector.load %arg16[%c0_42, %c24_43] : memref<8x32xf32, #tpu.memory_space<vmem>>, vector<8x8xf32>
    tpu.vector_store %arg16[%c0_42, %c24_43], %72 {strides = array<i32>} : memref<8x32xf32, #tpu.memory_space<vmem>>, vector<8x8xf32>,
    %c0_44 = arith.constant 0 : index
    %c0_45 = arith.constant 0 : index
    %74 = vector.load %arg16[%c0_44, %c0_45] : memref<8x32xf32, #tpu.memory_space<vmem>>, vector<8x32xf32>
    %c0_46 = arith.constant 0 : index
    %c0_47 = arith.constant 0 : index
    %75 = vector.load %arg11[%c0_46, %c0_47] : memref<32x32xf32, #tpu.memory_space<vmem>>, vector<32x32xf32>
    %cst_48 = arith.constant dense<0.000000e+00> : vector<8x32xf32>
    %76 = tpu.matmul %74, %75, %cst_48 {dimension_numbers = #tpu.dot_dimension_numbers<[1], [0], [0], [1], [0, 0, 1, 1], [], []>} : vector<8x32xf32>, vector<32x32xf32>, vector<8x32xf32> -> vector<8x32xf32>
    %c0_49 = arith.constant 0 : index
    %c0_50 = arith.constant 0 : index
    %77 = vector.load %arg12[%c0_49, %c0_50] : memref<1x32xf32, #tpu.memory_space<vmem>>, vector<1x32xf32>
    %78 = vector.broadcast %77 : vector<1x32xf32> to vector<8x32xf32>
    %79 = arith.addf %76, %78 : vector<8x32xf32>
    %c0_51 = arith.constant 0 : index
    %c0_52 = arith.constant 0 : index
    %c0_53 = arith.constant 0 : index
    %80 = vector.load %arg13[%c0_51, %c0_52, %c0_53] : memref<1x8x32xf32, #tpu.memory_space<vmem>>, vector<1x8x32xf32>
    %81 = vector.shape_cast %80 : vector<1x8x32xf32> to vector<8x32xf32>
    %82 = vector.shape_cast %79 : vector<8x32xf32> to vector<1x8x32xf32>
    tpu.vector_store %arg13[%c0_51, %c0_52, %c0_53], %82 {strides = array<i32>} : memref<1x8x32xf32, #tpu.memory_space<vmem>>, vector<1x8x32xf32>,
    return
  }
  func.func @transform_0(%arg0: i32, %arg1: i32) -> (i32, i32, i32) {
    %c0_i32 = arith.constant 0 : i32
    %c0_i32_0 = arith.constant 0 : i32
    return %arg0, %arg1, %c0_i32 : i32, i32, i32
  }
  func.func @transform_1(%arg0: i32, %arg1: i32) -> (i32, i32, i32) {
    %c0_i32 = arith.constant 0 : i32
    %c0_i32_0 = arith.constant 0 : i32
    %c0_i32_1 = arith.constant 0 : i32
    return %arg0, %c0_i32, %c0_i32_0 : i32, i32, i32
  }
  func.func @transform_2(%arg0: i32, %arg1: i32) -> (i32, i32, i32) {
    %c0_i32 = arith.constant 0 : i32
    %c0_i32_0 = arith.constant 0 : i32
    %c0_i32_1 = arith.constant 0 : i32
    return %arg0, %c0_i32, %c0_i32_0 : i32, i32, i32
  }
  func.func @transform_3(%arg0: i32, %arg1: i32) -> (i32, i32) {
    %c0_i32 = arith.constant 0 : i32
    %c0_i32_0 = arith.constant 0 : i32
    %c0_i32_1 = arith.constant 0 : i32
    return %c0_i32, %c0_i32_0 : i32, i32
  }
  func.func @transform_4(%arg0: i32, %arg1: i32) -> (i32, i32) {
    %c0_i32 = arith.constant 0 : i32
    %c0_i32_0 = arith.constant 0 : i32
    %c0_i32_1 = arith.constant 0 : i32
    return %c0_i32, %c0_i32_0 : i32, i32
  }
  func.func @transform_5(%arg0: i32, %arg1: i32) -> (i32, i32) {
    %c0_i32 = arith.constant 0 : i32
    %c0_i32_0 = arith.constant 0 : i32
    %c0_i32_1 = arith.constant 0 : i32
    return %c0_i32, %c0_i32_0 : i32, i32
  }
  func.func @transform_6(%arg0: i32, %arg1: i32) -> (i32, i32) {
    %c0_i32 = arith.constant 0 : i32
    %c0_i32_0 = arith.constant 0 : i32
    %c0_i32_1 = arith.constant 0 : i32
    return %c0_i32, %c0_i32_0 : i32, i32
  }
  func.func @transform_7(%arg0: i32, %arg1: i32) -> (i32, i32) {
    %c0_i32 = arith.constant 0 : i32
    %c0_i32_0 = arith.constant 0 : i32
    %c0_i32_1 = arith.constant 0 : i32
    return %c0_i32, %c0_i32_0 : i32, i32
  }
  func.func @transform_8(%arg0: i32, %arg1: i32) -> (i32, i32) {
    %c0_i32 = arith.constant 0 : i32
    %c0_i32_0 = arith.constant 0 : i32
    %c0_i32_1 = arith.constant 0 : i32
    return %c0_i32, %c0_i32_0 : i32, i32
  }
  func.func @transform_9(%arg0: i32, %arg1: i32) -> (i32, i32) {
    %c0_i32 = arith.constant 0 : i32
    %c0_i32_0 = arith.constant 0 : i32
    %c0_i32_1 = arith.constant 0 : i32
    return %c0_i32, %c0_i32_0 : i32, i32
  }
  func.func @transform_10(%arg0: i32, %arg1: i32) -> (i32, i32) {
    %c0_i32 = arith.constant 0 : i32
    %c0_i32_0 = arith.constant 0 : i32
    %c0_i32_1 = arith.constant 0 : i32
    return %c0_i32, %c0_i32_0 : i32, i32
  }
  func.func @transform_11(%arg0: i32, %arg1: i32) -> (i32, i32, i32) {
    %c0_i32 = arith.constant 0 : i32
    %c0_i32_0 = arith.constant 0 : i32
    return %arg0, %arg1, %c0_i32 : i32, i32, i32
  }
}

</mosaic_0001>

<bundles_post_ra>
// kernel: tpu_custom_call.1
= control target key start
LH: loop header
LB: loop body
LE: loop exit
PB: predicated region body
PF: predicated region fallthrough
CT: control target
= control target key end

     0   :  { %s3112_s0 = inlined_call_operand.hbm [shape: f32[2,16,32], index: 0, kind: input, shape index: {}]   ;;  %s3113_s1 = inlined_call_operand.hbm [shape: f32[2,16,32], index: 1, kind: input, shape index: {}]   ;;  %s3114_s2 = inlined_call_operand.hbm [shape: f32[2,16,32], index: 2, kind: input, shape index: {}]   ;;  %s3115_s3 = inlined_call_operand.hbm [shape: f32[32,32], index: 3, kind: input, shape index: {}]   ;;  %s3116_s4 = inlined_call_operand.vmem [shape: f32[1,32], index: 4, kind: input, shape index: {}]   ;;  %s3117_s5 = inlined_call_operand.hbm [shape: f32[32,32], index: 5, kind: input, shape index: {}]   ;;  %s3118_s6 = inlined_call_operand.vmem [shape: f32[1,32], index: 6, kind: input, shape index: {}]   ;;  %s3119_s7 = inlined_call_operand.hbm [shape: f32[32,32], index: 7, kind: input, shape index: {}]   ;;  %s3120_s8 = inlined_call_operand.vmem [shape: f32[1,32], index: 8, kind: input, shape index: {}]   ;;  %s3121_s9 = inlined_call_operand.hbm [shape: f32[32,32], index: 9, kind: input, shape index: {}]   ;;  %s3122_s10 = inlined_call_operand.vmem [shape: f32[1,32], index: 10, kind: input, shape index: {}]   ;;  %s3123_s11 = inlined_call_operand.hbm [shape: f32[2,16,32], index: 11, kind: output, shape index: {}]  }
   0x1   :  { %3143 = sst [smem:[#allocation32_spill]] %s3113_s1 }
   0x2   :  { %3144 = sst [smem:[#allocation33_spill]] %s3114_s2 }
   0x3   :  { %3145 = sst [smem:[#allocation34_spill]] %s3115_s3 }
   0x4   :  { %3146 = sst [smem:[#allocation35_spill]] %s3116_s4 }
   0x5   :  { %3147 = sst [smem:[#allocation36_spill]] %s3117_s5 }
   0x6   :  { %3148 = sst [smem:[#allocation37_spill]] %s3118_s6 }
   0x7   :  { %3149 = sst [smem:[#allocation38_spill]] %s3119_s7 }
   0x8   :  { %3150 = sst [smem:[#allocation39_spill]] %s3120_s8 }
   0x9   :  { %3151 = sst [smem:[#allocation40_spill]] %s3121_s9 }
   0xa   :  { %3152 = sst [smem:[#allocation41_spill]] %s3122_s10 }
   0xb   :  { %3153 = sst [smem:[#allocation42_spill]] %s3123_s11 }
   0xc   :  { %16 = vsyncpa [#allocation6], 0 }
   0xd   :  { %18 = vsyncpa [#allocation6 + $0x1], 0 }
   0xe   :  { %19 = vsyncpa [#allocation9], 0 }
   0xf   :  { %21 = vsyncpa [#allocation9 + $0x1], 0 }
  0x10   :  { %22 = vsyncpa [#allocation12], 0 }
  0x11   :  { %23 = vsyncpa [#allocation15], 0 }
  0x12   :  { %24 = vsyncpa [#allocation7], 0 }
  0x13   :  { %26 = vsyncpa [#allocation7 + $0x1], 0  ;;  %s2619_s17 = smov 0   ;;  %s2621_s18 = smov 0  }
  0x14   :  { %s2623_s19 = smov 0   ;;  %s2625_s20 = smov 0  }
  0x15   :  { %s2627_s21 = smov 0   ;;  %s2629_s22 = smov 0  }
  0x16   :  { %s2631_s23 = smov 0   ;;  %s2633_s24 = smov 0  }
  0x17   :  { %s2635_s25 = smov 0   ;;  %s2637_s26 = smov 0  }
  0x18   :  { %s2639_s27 = smov 0  }
  0x19 LB: > { %3154 = sst [smem:[#allocation23_spill]] %s2503_s18  ;;  %s2675_s28 = sadd.s32 4294967295, %s2539_s27   ;;  %s2539_s27 = sphi %s2639_s27, %s32_s27   ;;  %s2535_s26 = sphi %s2637_s26, %s3214_s26   ;;  %s2531_s25 = sphi %s2635_s25, %s3213_s25   ;;  %s2527_s24 = sphi %s2633_s24, %s3212_s24   ;;  %s2523_s23 = sphi %s2631_s23, %s3211_s23   ;;  %s2519_s22 = sphi %s2629_s22, %s3210_s22   ;;  %s2515_s21 = sphi %s2627_s21, %s3209_s21   ;;  %s2511_s20 = sphi %s2625_s20, %s3208_s20   ;;  %s2507_s19 = sphi %s2623_s19, %s3207_s19   ;;  %s2503_s18 = sphi %s2621_s18, %s3206_s18   ;;  %s2499_s17 = sphi %s2619_s17, %s3203_s17  }
  0x1a   : > { %3155 = sst [smem:[#allocation24_spill]] %s2511_s20  ;;  %p1836_p0 = scmp.ge.s32.totalorder %s2539_s27, 1 }
  0x1b   : > { %3156 = sst [smem:[#allocation25_spill]] %s2523_s23  ;;  %p3130_p1 = scmp.eq.s32.totalorder %s2675_s28, 0 }
  0x1c   : > { %3157 = sst [smem:[#allocation26_spill]] %s2527_s24  ;;  %p325_p2 = scmp.lt.s32.totalorder %s2539_s27, 5 }
  0x1d   : > { %s2541_s30 = smov [#allocation11]   ;;  %s2542_s14 = smov [#allocation14]  }
  0x1e   : > { %p2680_p3 = pnand %p1836_p0, %p325_p2  ;;  %s337_s12 = sshll.u32 %s2541_s30, 4  ;;  %s338_s12 = int_to_ptr.vmem [resolvable:$true] %s337_s12 }
  0x1f   : > { %s369_s15 = sshll.u32 %s2542_s14, 4  ;;  %s2230_s16 = scalar_lea.vmem %s338_s12, 512  ;;  %s370_s15 = int_to_ptr.vmem [resolvable:$true] %s369_s15 }
  0x20   : > { %s3158_s29 = scalar_select %p2680_p3, 1, 0 }
  0x21   : > { %p2064_p4 = pneg %p2680_p3  ;;  %p2231_p7 = scmp.ne.s32.totalorder %s338_s12, %s2230_s16 }
  0x22   : > { %3159 = sst [smem:[#allocation27_spill]] %s3158_s29  ;;  %p2238_p10 = scmp.lt.s32.totalorder %s338_s12, %s338_s12 }
  0x23   : > { %p2688_p5 = pnand %p2064_p4, %p3130_p1  ;;  %p2239_p11 = scmp.lt.s32.totalorder %s2230_s16, %s2230_s16 }
  0x25   : > { %p2221_p6 = pneg %p2688_p5  ;;  %p2240_p12 = por %p2239_p11, %p2238_p10 }
  0x27   : > { %p2233_p8 = pnand %p2231_p7, %p2221_p6 }
  0x29   : > { %p2234_p9 = pneg %p2233_p8 }
  0x2b   : > { %p2241_p13 = pnand %p2240_p12, %p2234_p9 }
  0x2d   : > { %2244 = shalt.err (!%p2241_p13)
}
  0x2e   : > { %s3125_s30 = smov 128   ;;  %s3127_s11 = smov 8  }
  0x2f   : > { %s3161_s3 = sld [smem:[#allocation34_spill]]  ;;  %s2256_s24 = scalar_lea.vmem %s370_s15, 512 }
  0x30   : > { %p2257_p0 = scmp.ne.s32.totalorder %s370_s15, %s2256_s24  ;;  %p2264_p7 = scmp.lt.s32.totalorder %s370_s15, %s370_s15 }
  0x31   : > { %p2265_p8 = scmp.lt.s32.totalorder %s2256_s24, %s2256_s24 }
  0x32   : > { %p2259_p2 = pnand %p2257_p0, %p2221_p6 }
  0x33   : > { %p2266_p9 = por %p2265_p8, %p2264_p7 }
  0x34   : > { %p2260_p4 = pneg %p2259_p2 }
  0x35   : > { %2067 = dma.hbm_to_vmem [thread:$0]  (!%p2688_p5), %s3161_s3, 512, %s338_s12, [#allocation12], %s3125_s30, %s3125_s30, %s3127_s11  }
  0x36   : > { %p2267_p10 = pnand %p2266_p9, %p2260_p4 }
  0x38   : > { %2270 = shalt.err (!%p2267_p10)
}
  0x39   : > { %s3162_s7 = sld [smem:[#allocation38_spill]]  ;;  %p61_p11 = scmp.eq.s32.totalorder %s2539_s27, 0 }
  0x3a   : > { %p86_p12 = scmp.ne.s32.totalorder %s2507_s19, %s2503_s18  ;;  %p92_p13 = scmp.ne.s32.totalorder %s2503_s18, %s2499_s17 }
  0x3b   : > { %p3129_p0 = scmp.lt.s32.totalorder %s2539_s27, 4  ;;  %s422_s4 = sand.u32 1, %s2539_s27  }
  0x3c   : > { %p88_p2 = por %p86_p12, %p61_p11  ;;  %p2727_p4 = por %p92_p13, %p3130_p1 }
  0x3d   : > { %s424_s24 = sand.u32 1, %s2507_s19   ;;  %s1892_s12 = sshll.u32 %s2535_s26, 8 }
  0x3e   : > { %s3163_s10 = scalar_select %p2727_p4, 1, 0 }
  0x3f   : > { %2073 = dma.hbm_to_vmem [thread:$0]  (!%p2688_p5), %s3162_s7, 512, %s370_s15, [#allocation15], %s3125_s30, %s3125_s30, %s3127_s11  }
  0x40   : > { %3164 = sst [smem:[#allocation28_spill]] %s3163_s10  ;;  %s1845_s14 = sshll.u32 %s424_s24, 4 }
  0x41   : > { %s3165_s1 = sld [smem:[#allocation32_spill]]  ;;  %p2738_p7 = pnand %p3129_p0, %p88_p2 }
  0x42   : > { %s426_s17 = scalar_lea.vmem [#allocation8], %s1845_s14  ;;  %s2742_s11 = scalar_lea.sflag [#allocation9], %s422_s4 }
  0x43   : > { %s433_s30 = sshll.u32 %s426_s17, 4  ;;  %p3135_p8 = pneg %p2738_p7  ;;  %s434_s30 = int_to_ptr.vmem [resolvable:$true] %s433_s30 }
  0x44   : > { %s2284_s7 = scalar_lea.vmem %s434_s30, 256  ;;  %s2545_s3 = smov [#allocation8]  }
  0x45   : > { %p2285_p9 = scmp.ne.s32.totalorder %s434_s30, %s2284_s7  ;;  %s2289_s24 = sshll.u32 %s2545_s3, 4  ;;  %s2290_s24 = int_to_ptr.vmem [resolvable:$false] %s2289_s24 }
  0x46   : > { %s2291_s16 = scalar_lea.vmem %s2290_s24, 512  ;;  %p2292_p13 = scmp.lt.s32.totalorder %s434_s30, %s2290_s24 }
  0x47   : > { %s432_s8 = scalar_lea.hbm %s3165_s1, %s1892_s12  ;;  %p2287_p10 = pnand %p2285_p9, %p3135_p8 }
  0x48   : > { %p2293_p2 = scmp.lt.s32.totalorder %s2291_s16, %s2284_s7 }
  0x49   : > { %p2288_p12 = pneg %p2287_p10 }
  0x4a   : > { %p2294_p0 = por %p2293_p2, %p2292_p13 }
  0x4c   : > { %p2295_p1 = pnand %p2294_p0, %p2288_p12 }
  0x4e   : > { %2298 = shalt.err (!%p2295_p1)
}
  0x4f   : > { %s3167_s4 = smov 8   ;;  %s3168_s17 = smov 128  }
  0x50   : > { %2083 = dma.hbm_to_vmem [thread:$0]  (!%p2738_p7), %s432_s8, 256, %s434_s30, %s2742_s11, %s3168_s17, %s3168_s17, %s3167_s4  }
  0x51   : > { %s3169_s2 = sld [smem:[#allocation33_spill]]  ;;  %s447_s3 = scalar_lea.vmem [#allocation10], %s1845_s14 }
  0x52   : > { %s454_s10 = sshll.u32 %s447_s3, 4  ;;  %s2546_s7 = smov [#allocation13]   ;;  %s2760_s10 = int_to_ptr.vmem [resolvable:$true] %s454_s10 }
  0x53   : > { %s353_s24 = sshll.u32 %s2546_s7, 4  ;;  %s2547_s16 = smov [#allocation16]   ;;  %s354_s24 = int_to_ptr.vmem [resolvable:$true] %s353_s24 }
  0x54   : > { %s385_s18 = sshll.u32 %s2547_s16, 4  ;;  %s2310_s29 = scalar_lea.vmem %s354_s24, 512  ;;  %s386_s18 = int_to_ptr.vmem [resolvable:$true] %s385_s18 }
  0x55   : > { %p2311_p1 = scmp.ne.s32.totalorder %s354_s24, %s2310_s29  ;;  %p2318_p10 = scmp.lt.s32.totalorder %s354_s24, %s354_s24 }
  0x56   : > { %p2319_p12 = scmp.lt.s32.totalorder %s2310_s29, %s2310_s29 }
  0x57   : > { %s2758_s23 = scalar_lea.hbm %s3169_s2, %s1892_s12  ;;  %p2313_p0 = pnand %p2311_p1, %p2221_p6 }
  0x58   : > { %p2320_p13 = por %p2319_p12, %p2318_p10 }
  0x59   : > { %p2314_p9 = pneg %p2313_p0 }
  0x5b   : > { %p2321_p2 = pnand %p2320_p13, %p2314_p9 }
  0x5d   : > { %2324 = shalt.err (!%p2321_p2)
}
  0x5e   : > { %s3170_s5 = sld [smem:[#allocation36_spill]]  ;;  %s2336_s8 = scalar_lea.vmem %s386_s18, 512 }
  0x5f   : > { %p2337_p8 = scmp.ne.s32.totalorder %s386_s18, %s2336_s8  ;;  %p2344_p10 = scmp.lt.s32.totalorder %s386_s18, %s386_s18 }
  0x60   : > { %p2345_p9 = scmp.lt.s32.totalorder %s2336_s8, %s2336_s8 }
  0x61   : > { %p2339_p1 = pnand %p2337_p8, %p2221_p6 }
  0x62   : > { %p2346_p12 = por %p2345_p9, %p2344_p10 }
  0x63   : > { %p2340_p0 = pneg %p2339_p1 }
  0x64   : > { %2070 = dma.hbm_to_vmem [thread:$0]  (!%p2688_p5), %s3170_s5, 512, %s354_s24, [#allocation12], %s3168_s17, %s3168_s17, %s3167_s4  }
  0x65   : > { %p2347_p13 = pnand %p2346_p12, %p2340_p0 }
  0x67   : > { %2350 = shalt.err (!%p2347_p13)
}
  0x68   : > { %s3171_s9 = sld [smem:[#allocation40_spill]]  ;;  %s1835_s13 = sadd.s32 4294967294, %s2539_s27  }
  0x69   : > { %s41_s12 = sadd.s32 1, %s2531_s25  ;;  %s44_s14 = sadd.s32 1, %s2535_s26 }
  0x6a   : > { %p42_p6 = scmp.ge.s32.totalorder %s41_s12, 2  ;;  %s53_s3 = sadd.s32 1, %s2519_s22 }
  0x6b   : > { %p60_p8 = scmp.ne.s32.totalorder %s2519_s22, %s2515_s21  ;;  %p66_p2 = scmp.ne.s32.totalorder %s2515_s21, %s2511_s20 }
  0x6c   : > { %s3216_s12 = smov (%p42_p6, %s41_s12), 0  ;;  %s3218_s14 = smov (!%p42_p6, %s44_s14), %s2535_s26 }
  0x6d   : > { %3172 = sst [smem:[#allocation29_spill]] %s3216_s12  ;;  %s49_s7 = ssub.s32 %s2531_s25, %s3216_s12 }
  0x6e   : > { %2076 = dma.hbm_to_vmem [thread:$0]  (!%p2688_p5), %s3171_s9, 512, %s386_s18, [#allocation15], %s3168_s17, %s3168_s17, %s3167_s4  }
  0x6f   : > { %p2799_p5 = por %p61_p11, %p60_p8  ;;  %p46_p1 = scmp.ge.s32.totalorder %s3218_s14, 2 }
  0x70   : > { %p3174_p0 = scmp.eq.s32.totalorder %s2675_s28, 0  ;;  %s79_s16 = sadd.s32 1, %s2507_s19 }
  0x71   : > { %p312_p9 = scmp.eq.s32.totalorder %s2675_s28, 3  ;;  %s3220_s14 = smov (%p46_p1, %s3218_s14), 0 }
  0x72   : > { %p2808_p10 = por %p3174_p0, %p66_p2  ;;  %3176 = sst [smem:[#allocation30_spill]] %s3220_s14 }
  0x73   : > { %p2816_p12 = por %p312_p9, %p60_p8  ;;  %p318_p11 = scmp.eq.s32.totalorder %s1835_s13, 3 }
  0x74   : > { %s48_s6 = ssub.s32 %s2535_s26, %s3220_s14  ;;  %s402_s8 = sand.u32 1, %s2519_s22  }
  0x75   : > { %s3177_s1 = scalar_select %p2816_p12, 1, 0 }
  0x76   : > { %s50_s29 = sor.u32 %s49_s7, %s48_s6  ;;  %p77_p13 = scmp.eq.s32.totalorder %s48_s6, 0 }
  0x77   : > { %3178 = sst [smem:[#allocation31_spill]] %s3177_s1  ;;  %p51_p6 = scmp.eq.s32.totalorder %s50_s29, 0 }
  0x78   : > { %p2826_p0 = por %p318_p11, %p66_p2  ;;  %s1842_s13 = sshll.u32 %s402_s8, 3 }
  0x79   : > { %s2831_s2 = scalar_select %p77_p13, %s2507_s19, %s79_s16  }
  0x7a   : > { %s3179_s30 = scalar_select %p2826_p0, 1, 0 }
  0x7b   : > { %s2834_s5 = scalar_select %p51_p6, %s2519_s22, %s53_s3  }
  0x7c   : > { %s1843_s9 = sshll.u32 %s2535_s26, 1  ;;  %s406_s12 = scalar_lea.vmem [#allocation5], %s1842_s13 }
  0x7d   : > { %s411_s14 = sadd.s32 %s2531_s25, %s1843_s9  ;;  %s415_s7 = sshll.u32 %s406_s12, 4  ;;  %s2840_s7 = int_to_ptr.vmem [resolvable:$true] %s415_s7 }
  0x7e   : > { %s1844_s1 = sshll.u32 %s411_s14, 7  ;;  %p3180_p8 = scmp.lt.s32.totalorder %s2539_s27, 4 }
  0x7f   : > { %s2845_s20 = scalar_lea.hbm %s3112_s0, %s1844_s1  ;;  %s2364_s16 = scalar_lea.vmem %s2760_s10, 256 }
  0x80   : > { %p2851_p2 = pnand %p3180_p8, %p2799_p5  ;;  %p2365_p1 = scmp.ne.s32.totalorder %s2760_s10, %s2364_s16 }
  0x81   : > { %p3182_p9 = pneg %p2738_p7  ;;  %s2548_s9 = smov [#allocation10]  }
  0x82   : > { %s2369_s12 = sshll.u32 %s2548_s9, 4  ;;  %s2370_s12 = int_to_ptr.vmem [resolvable:$false] %s2369_s12 }
  0x83   : > { %p2367_p11 = pnand %p2365_p1, %p3182_p9  ;;  %s2371_s14 = scalar_lea.vmem %s2370_s12, 512 }
  0x84   : > { %p2372_p6 = scmp.lt.s32.totalorder %s2760_s10, %s2370_s12  ;;  %p2373_p0 = scmp.lt.s32.totalorder %s2371_s14, %s2364_s16 }
  0x85   : > { %p2368_p13 = pneg %p2367_p11 }
  0x86   : > { %p2374_p12 = por %p2373_p0, %p2372_p6 }
  0x88   : > { %p2375_p4 = pnand %p2374_p12, %p2368_p13 }
  0x8a   : > { %2378 = shalt.err (!%p2375_p4)
}
  0x8b   : > { %2086 = dma.hbm_to_vmem [thread:$0]  (!%p2738_p7), %s2758_s23, 256, %s2760_s10, %s2742_s11, %s3168_s17, %s3168_s17, %s3167_s4  }
  0x8c   : > { %s403_s18 = scalar_lea.sflag [#allocation6], %s402_s8  ;;  %p2381_p5 = pneg %p2851_p2 }
  0x8d   : > { %s2392_s1 = scalar_lea.vmem %s2840_s7, 128  ;;  %s2549_s15 = smov [#allocation5]  }
  0x8e   : > { %p2393_p4 = scmp.ne.s32.totalorder %s2840_s7, %s2392_s1  ;;  %s2397_s13 = sshll.u32 %s2549_s15, 4  ;;  %s2398_s13 = int_to_ptr.vmem [resolvable:$false] %s2397_s13 }
  0x8f   : > { %s2399_s6 = scalar_lea.vmem %s2398_s13, 256  ;;  %p2400_p8 = scmp.lt.s32.totalorder %s2840_s7, %s2398_s13 }
  0x90   : > { %p2395_p12 = pnand %p2393_p4, %p2381_p5  ;;  %p2401_p1 = scmp.lt.s32.totalorder %s2399_s6, %s2392_s1 }
  0x92   : > { %p2396_p0 = pneg %p2395_p12  ;;  %p2402_p9 = por %p2401_p1, %p2400_p8 }
  0x94   : > { %p2403_p11 = pnand %p2402_p9, %p2396_p0 }
  0x96   : > { %2406 = shalt.err (!%p2403_p11)
}
  0x97   : > { %2080 = dma.hbm_to_vmem [thread:$0]  (!%p2851_p2), %s2845_s20, 128, %s2840_s7, %s403_s18  }
  0x98   : > { %466 = sbr.rel (%p2680_p3) target bundleno = 2550 (0x9f6), region = 64  ;;  %s2883_s23 = sand.u32 (!%p2680_p3), 1, %s2515_s21  }
  0x99   : > { %s1852_s10 = sshll.u32 (!%p2680_p3), %s2883_s23, 3  ;;  %s469_s4 = scalar_lea.sflag (!%p2680_p3), [#allocation6], %s2883_s23 }
  0x9a   : > { %s2887_s17 = scalar_lea.vmem (!%p2680_p3), [#allocation5], %s1852_s10 }
  0x9d   : > { %2478 = dma.done.wait (%p2808_p10), %s469_s4, 128  }
  0x9e   : > { %2480 = vsyncadd (%p2808_p10), %s469_s4, 4294967168  ;;  %s3184_s20 = sld [smem:[#allocation23_spill]]  ;;  %s477_s7 = sand.u32 1, %s2675_s28  }
  0x9f   : > { %s3185_s8 = sld [smem:[#allocation28_spill]]  ;;  %s478_s16 = scalar_lea.sflag [#allocation9], %s477_s7 }
  0xa4   : > { %s479_s29 = sand.u32 1, %s3184_s20  }
  0xa5   : > { %s2895_s3 = sshll.u32 %s479_s29, 4  ;;  %p3186_p3 = scmp.ne.s32.totalorder %s3185_s8, 0 }
  0xa6   : > { %s481_s9 = scalar_lea.vmem [#allocation8], %s2895_s3 }
  0xa7   : > { %2482 = dma.done.wait (%p3186_p3), %s478_s16, 512  }
  0xa8   : > { %2484 = vsyncadd (%p3186_p3), %s478_s16, 4294966784  ;;  %s490_s12 = scalar_lea.vmem [#allocation10], %s2895_s3  ;;  %p3187_p7 = scmp.eq.s32.totalorder %s2675_s28, 0 }
  0xaa   : > { %2486 = dma.done.wait (%p3187_p7), [#allocation12], 1024   ;;  %p3188_p10 = pmov %p3187_p7 }
  0xab   : > { %p3189_p2 = pmov %p3187_p7 }
  0xac   : > { %2488 = vsyncadd (%p3188_p10), [#allocation12], 4294966272 }
  0xad   : > { %2490 = dma.done.wait (%p3189_p2), [#allocation15], 1024   ;;  %p3190_p13 = pmov %p3189_p2 }
  0xae   : > { %s2911_s24 = scalar_lea.vmem [#allocation17], %s1852_s10  ;;  %s3191_s14 = sld [smem:[#allocation25_spill]] }
  0xaf   : > { %2492 = vsyncadd (%p3190_p13), [#allocation15], 4294966272 }
  0xb4   : > { %p1860_p6 = scmp.ne.s32.totalorder %s3191_s14, 0 }
  0xb5   : > { %s3192_s1 = sld [smem:[#allocation37_spill]] (!%p1860_p6) }
  0xb6   : > { %558 = sbr.rel (%p1860_p6) target bundleno = 396 (0x18c), region = 96  ;;  %s3193_s6 = sld [smem:[#allocation39_spill]] (!%p1860_p6) }
  0xbb   : > { %v564_v0 = vld [vmem:[#allocation13 + $0x18] sm:$0xff]  ;;  %v563_v2 = vld [vmem:[#allocation13 + $0x10] sm:$0xff]  ;;  %v562_v4 = vld [vmem:[#allocation13 + $0x8] sm:$0xff]  ;;  %vm572_vm0 = vcmask 261120  }
  0xbc   : > { %v661_v1 = vld [vmem:[#allocation14 + $0x18] sm:$0xff]  ;;  %1940 = vmatprep.subr.mxu0 %v564_v0  ;;  %v660_v3 = vld [vmem:[#allocation14 + $0x10] sm:$0xff]  ;;  %v659_v5 = vld [vmem:[#allocation14 + $0x8] sm:$0xff] }
  0xbd   : > { %1951 = vmatprep.subr.mxu1 %v661_v1  ;;  %1941 = vmatpush3.msra.mxu0 %v564_v0  ;;  %v561_v6 = vld [vmem:[#allocation13] sm:$0xff]  ;;  %v560_v10 = vld [vmem:[%s481_s9 + $0x8] sm:$0xff] }
  0xbe   : > { %1952 = vmatpush3.msra.mxu1 %v661_v1  ;;  %1942 = vmatprep.subr.mxu0 %v563_v2  ;;  %v658_v7 = vld [vmem:[#allocation14] sm:$0xff]  ;;  %v657_v11 = vld [vmem:[%s490_s12 + $0x8] sm:$0xff] }
  0xbf   : > { %1953 = vmatprep.subr.mxu1 %v660_v3  ;;  %1943 = vmatpush3.msra.mxu0 %v563_v2  ;;  %v559_v8 = vld [vmem:[%s481_s9] sm:$0xff]  ;;  %v1861_v12 = vld [vmem:[%s3192_s1] ss:$0 sm:$0xff] }
  0xc0   : > { %1954 = vmatpush3.msra.mxu1 %v660_v3  ;;  %1944 = vmatprep.subr.mxu0 %v562_v4  ;;  %v656_v9 = vld [vmem:[%s490_s12] sm:$0xff]  ;;  %v1864_v13 = vld [vmem:[%s3193_s6] ss:$0 sm:$0xff] }
  0xc1   : > { %1955 = vmatprep.subr.mxu1 %v659_v5  ;;  %1945 = vmatpush3.msra.mxu0 %v562_v4 }
  0xc2   : > { %1956 = vmatpush3.msra.mxu1 %v659_v5  ;;  %1946 = vmatprep.subr.mxu0 %v561_v6 }
  0xc3   : > { %1957 = vmatprep.subr.mxu1 %v658_v7  ;;  %1947 = vmatpush3.msra.mxu0 %v561_v6 }
  0xc4   : > { %1948 = vmatprep.mubr.msk.f32.mxu0 %vm572_vm0, %v559_v8  ;;  %1958 = vmatpush3.msra.mxu1 %v658_v7 }
  0xc5   : > { %1959 = vmatprep.mubr.msk.f32.mxu1 %vm572_vm0, %v656_v9  ;;  %1949 = vmatmul.mubr.msk.f32.vlgmr.msra.gmra.mxu0 %vm572_vm0, %v560_v10 }
  0xc6   : > { %1960 = vmatmul.mubr.msk.f32.vlgmr.msra.gmra.mxu1 %vm572_vm0, %v657_v11 }
 0x185   : > { %v1950_v14 = vpop.f32.mrf.mxu0 }
 0x186   : > { %v1961_v15 = vpop.f32.mrf.mxu1  ;;  %v651_v16 = vadd.f32 %v1950_v14, %v1861_v12 }
 0x187   : > { %v747_v17 = vadd.f32 %v1961_v15, %v1864_v13  ;;  %v645_v18 = vpop.f32.mrf.mxu0 }
 0x188   : > { %v741_v19 = vpop.f32.mrf.mxu1  ;;  %655 = vst.msk [vmem:[#allocation2 + $0x8] sm:$0xff] %vm572_vm0, %v651_v16  ;;  %v646_v20 = vadd.f32 %v1861_v12, %v645_v18 }
 0x189   : > { %751 = vst.msk [vmem:[#allocation3 + $0x8] sm:$0xff] %vm572_vm0, %v747_v17  ;;  %v742_v21 = vadd.f32 %v1864_v13, %v741_v19 }
 0x18a   : > { %654 = vst.msk [vmem:[#allocation2] sm:$0xff] %vm572_vm0, %v646_v20 }
 0x18b   : > { %750 = vst.msk [vmem:[#allocation3] sm:$0xff] %vm572_vm0, %v742_v21 }
 0x18c PF: > { %v756_v22 = vld [vmem:[#allocation11 + $0x18] sm:$0xff]  ;;  %v2550_v23 = vmov 0.0   ;;  %v755_v24 = vld [vmem:[#allocation11 + $0x10] sm:$0xff]  ;;  %vm2551_vm1 = vmmov 0   ;;  %vm842_vm2 = vcmask 64512   ;;  %v754_v27 = vld [vmem:[#allocation11 + $0x8] sm:$0xff] }
 0x18d   : > { %1962 = vmatprep.subr.mxu0 %v2550_v23  ;;  %1970 = vmatprep.mubr.msk.f32.mxu0 %vm2551_vm1, %v2550_v23  ;;  %s2552_s11 = smov 120   ;;  %v753_v28 = vld [vmem:[#allocation11] sm:$0xff]  ;;  %v752_v29 = vld [vmem:[%s2887_s17] sm:$0xff]  ;;  %vm764_vm3 = vcmask 261120   ;;  %s3194_s17 = sld [smem:[#allocation35_spill]]  ;;  %vm922_vm4 = vcmask 130048  }
 0x18e   : > { %1963 = vmatpush3.msra.mxu0 %v756_v22  ;;  %1973 = vmatprep.subr.mxu1 %v2550_v23  ;;  %s2553_s20 = smov 112   ;;  %s2554_s8 = smov 104   ;;  %vm1192_vm5 = vcmask 130112   ;;  %vm1378_vm6 = vcmask 195712   ;;  %vm1564_vm7 = vcmask 261312  }
 0x18f   : > { %v839_v25 = vld [vmem:[#allocation2 + $0x8] sm:$0xff]  ;;  %1964 = vmatprep.subr.mxu0 %v2550_v23  ;;  %1977 = vmatprep.mubr.msk.f32.mxu1 %vm2551_vm1, %v2550_v23  ;;  %s2555_s7 = smov 16   ;;  %s2556_s29 = smov 8  }
 0x190   : > { %1974 = vmatpush3.xpose.msk.msra.mxu1 %vm842_vm2, %v839_v25  ;;  %1965 = vmatpush3.msra.mxu0 %v755_v24  ;;  %v2962_v34 = vld [vmem:[#allocation3 + $0x8] sm:$0xff]  ;;  %s3195_s3 = sld [smem:[#allocation26_spill]]  ;;  %s2557_s9 = smov 24  }
 0x191   : > { %v1008_v26 = vld [vmem:[#allocation2] sm:$0xff]  ;;  %1966 = vmatprep.subr.mxu0 %v2550_v23  ;;  %1975 = vmatprep.subr.mxu1 %v2550_v23  ;;  %s3196_s16 = sld [smem:[#allocation25_spill]]  ;;  %s1668_s6 = sshll.u32 %s2911_s24, 4  ;;  %s1669_s6 = int_to_ptr.vmem [resolvable:$true] %s1668_s6 }
 0x192   : > { %1016 = vrot.lane.b32.xlu1 %v1008_v26, %s2552_s11  ;;  %1967 = vmatpush3.msra.mxu0 %v754_v27  ;;  %v2966_v35 = vld [vmem:[#allocation3] sm:$0xff]  ;;  %s3197_s12 = sld [smem:[#allocation31_spill]] }
 0x193   : > { %1968 = vmatprep.subr.mxu0 %v2550_v23  ;;  %v1867_v30 = vld [vmem:[%s3194_s17] ss:$0 sm:$0xff]  ;;  %s3198_s15 = sld [smem:[#allocation41_spill]] }
 0x194   : > { %1976 = vmatpush3.xpose.msk.msra.mxu1 %vm842_vm2, %v1008_v26  ;;  %1969 = vmatpush3.msra.mxu0 %v753_v28  ;;  %s3199_s4 = sld [smem:[#allocation42_spill]] }
 0x195   : > { %1980 = vmatprep.subr.mxu1 %v2550_v23  ;;  %1971 = vmatmul.mubr.msk.f32.vlgmr.msra.gmra.mxu0 %vm764_vm3, %v752_v29 }
 0x196   : > { %1994 = vmatprep.subr.mxu0 %v2550_v23  ;;  %1998 = vmatprep.mubr.msk.f32.mxu0 %vm2551_vm1, %v2550_v23  ;;  %s1888_s14 = sshll.u32 %s3195_s3, 1 }
 0x197   : > { %s1664_s28 = sadd.s32 %s3196_s16, %s1888_s14 }
 0x198   : > { %s1889_s13 = sshll.u32 %s1664_s28, 7  ;;  %p3200_p4 = scmp.ne.s32.totalorder %s3197_s12, 0 }
 0x19a   : > { %s3054_s17 = scalar_lea.hbm %s3199_s4, %s1889_s13 }
 0x204   : > { %v1017_v47 = vpop.permute.xlu1 %1016 }
 0x255   : > { %v834_v31 = vpop.f32.mrf.mxu0 }
 0x256   : > { %v835_v32 = vadd.f32 %v1867_v30, %v834_v31 }
 0x257   : > { %v1972_v33 = vpop.f32.mrf.mxu0 }
 0x258   : > { %1012 = vrot.lane.b32.xlu1 %v835_v32, %s2552_s11  ;;  %1978 = vmatmul.mubr.msk.f32.vlgmr.msra.gmra.mxu1 %vm842_vm2, %v835_v32 }
 0x259   : > { %1984 = vmatprep.mubr.msk.f32.mxu1 %vm2551_vm1, %v2550_v23  ;;  %1981 = vmatpush3.msra.mxu1 %v2962_v34 }
 0x25a   : > { %1982 = vmatprep.subr.mxu1 %v2550_v23 }
 0x25b   : > { %1983 = vmatpush3.msra.mxu1 %v2966_v35 }
 0x25c   : > { %1987 = vmatprep.subr.mxu1 %v2550_v23 }
 0x2ca   : > { %v1013_v50 = vpop.permute.xlu1 %1012 }
 0x318   : > { %v918_v36 = vpop.f32.mrf.mxu1 }
 0x319   : > { %v923_v37 = vsel %vm922_vm4, %v918_v36, -inf }
 0x31a   : > { %924 = vmax.xlane.f32.xlu0 %v923_v37  ;;  %v1979_v38 = vpop.f32.mrf.mxu1 }
 0x31b   : > { %v1570_v38 = vld [vmem:[#allocation16 + $0x18] sm:$0xff] }
 0x330   : > { %1018 = vrot.lane.b32.xlu0 %v839_v25, %s2552_s11 }
 0x334   : > { %1109 = vrot.lane.b32.xlu0 %v2962_v34, %s2552_s11 }
 0x338   : > { %1107 = vrot.lane.b32.xlu0 %v2966_v35, %s2552_s11 }
 0x33c   : > { %1204 = vrot.lane.b32.xlu0 %v839_v25, %s2553_s20 }
 0x340   : > { %1202 = vrot.lane.b32.xlu0 %v1008_v26, %s2553_s20 }
 0x344   : > { %1198 = vrot.lane.b32.xlu0 %v835_v32, %s2553_s20 }
 0x348   : > { %1295 = vrot.lane.b32.xlu0 %v2962_v34, %s2553_s20 }
 0x34c   : > { %1390 = vrot.lane.b32.xlu0 %v839_v25, %s2554_s8 }
 0x350   : > { %1388 = vrot.lane.b32.xlu0 %v1008_v26, %s2554_s8 }
 0x354   : > { %1384 = vrot.lane.b32.xlu0 %v835_v32, %s2554_s8 }
 0x3a3   : > { %v925_v39 = vpop.xlane.xlu0 %924 }
 0x3a4   : > { %v926_v40 = vsub.f32 %v918_v36, %v925_v39  ;;  %v1569_v39 = vld [vmem:[#allocation16 + $0x10] sm:$0xff] }
 0x3a6   : > { %v927_v41 = vmul.f32 1.442695, %v926_v40  ;;  %v1568_v40 = vld [vmem:[#allocation16 + $0x8] sm:$0xff] }
 0x3a7   : > { %v1019_v42 = vpop.permute.xlu0 %1018 }
 0x3a8   : > { %2203 = vpow2.f32 %v927_v41  ;;  %v1567_v41 = vld [vmem:[#allocation16] sm:$0xff] }
 0x3ab   : > { %v1110_v43 = vpop.permute.xlu0 %1109 }
 0x3ac   : > { %1995 = vmatpush3.msra.mxu0 %v1110_v43 }
 0x3ad   : > { %1996 = vmatprep.subr.mxu0 %v2550_v23 }
 0x3af   : > { %v1108_v44 = vpop.permute.xlu0 %1107 }
 0x3b0   : > { %1997 = vmatpush3.msra.mxu0 %v1108_v44 }
 0x3b1   : > { %2001 = vmatprep.subr.mxu0 %v2550_v23 }
 0x3b3   : > { %v1205_v45 = vpop.permute.xlu0 %1204 }
 0x3b5   : > { %v2986_v46 = vpop.eup %2203 }
 0x3b6   : > { %1985 = vmatmul.mubr.msk.f32.vlgmr.msra.gmra.mxu1 %vm922_vm4, %v2986_v46  ;;  %v929_v28 = vsel %vm922_vm4, %v2986_v46, 0.0 }
 0x3b7   : > { %1988 = vmatpush3.xpose.msk.msra.mxu1 %vm842_vm2, %v1019_v42  ;;  %v1203_v48 = vpop.permute.xlu0 %1202  ;;  %1991 = vmatprep.mubr.msk.f32.mxu1 %vm2551_vm1, %v2550_v23 }
 0x3b8   : > { %1989 = vmatprep.subr.mxu1 %v2550_v23 }
 0x3bb   : > { %1990 = vmatpush3.xpose.msk.msra.mxu1 %vm842_vm2, %v1017_v47  ;;  %v1199_v49 = vpop.permute.xlu0 %1198 }
 0x3bc   : > { %2008 = vmatprep.subr.mxu1 %v2550_v23 }
 0x3be   : > { %1992 = vmatmul.mubr.msk.f32.vlgmr.msra.gmra.mxu1 %vm842_vm2, %v1013_v50 }
 0x3bf   : > { %v1296_v51 = vpop.permute.xlu0 %1295  ;;  %2012 = vmatprep.mubr.msk.f32.mxu1 %vm2551_vm1, %v2550_v23 }
 0x3c0   : > { %2009 = vmatpush3.msra.mxu1 %v1296_v51 }
 0x3c1   : > { %2010 = vmatprep.subr.mxu1 %v2550_v23 }
 0x3c3   : > { %v1391_v9 = vpop.permute.xlu0 %1390 }
 0x3c7   : > { %v1389_v11 = vpop.permute.xlu0 %1388 }
 0x3cb   : > { %v1385_v12 = vpop.permute.xlu0 %1384 }
 0x476   : > { %v3000_v52 = vpop.f32.mrf.mxu1 }
 0x478   : > { %v1986_v53 = vpop.f32.mrf.mxu1 }
 0x47e   : > { %v1092_v54 = vpop.f32.mrf.mxu1 }
 0x47f   : > { %v1096_v55 = vsel %vm922_vm4, %v1092_v54, -inf }
 0x480   : > { %1097 = vmax.xlane.f32.xlu1 %v1096_v55  ;;  %v1993_v56 = vpop.f32.mrf.mxu1 }
 0x509   : > { %v1098_v57 = vpop.xlane.xlu1 %1097 }
 0x50a   : > { %v1099_v58 = vsub.f32 %v1092_v54, %v1098_v57 }
 0x50c   : > { %v1100_v59 = vmul.f32 1.442695, %v1099_v58 }
 0x50e   : > { %2205 = vpow2.f32 %v1100_v59 }
 0x51b   : > { %v2206_v60 = vpop.eup %2205 }
 0x51c   : > { %1999 = vmatmul.mubr.msk.f32.vlgmr.msra.gmra.mxu0 %vm922_vm4, %v2206_v60  ;;  %v1102_v2 = vsel %vm922_vm4, %v2206_v60, 0.0 }
 0x51d   : > { %2002 = vmatpush3.xpose.msk.msra.mxu0 %vm842_vm2, %v1205_v45  ;;  %2005 = vmatprep.mubr.msk.f32.mxu0 %vm2551_vm1, %v2550_v23 }
 0x51e   : > { %2003 = vmatprep.subr.mxu0 %v2550_v23 }
 0x521   : > { %2004 = vmatpush3.xpose.msk.msra.mxu0 %vm842_vm2, %v1203_v48 }
 0x522   : > { %2022 = vmatprep.subr.mxu0 %v2550_v23 }
 0x524   : > { %2006 = vmatmul.mubr.msk.f32.vlgmr.msra.gmra.mxu0 %vm842_vm2, %v1199_v49 }
 0x525   : > { %2026 = vmatprep.mubr.msk.f32.mxu0 %vm2551_vm1, %v2550_v23 }
 0x5dc   : > { %v1182_v61 = vpop.f32.mrf.mxu0 }
 0x5de   : > { %v2000_v62 = vpop.f32.mrf.mxu0 }
 0x5e4   : > { %v1278_v63 = vpop.f32.mrf.mxu0 }
 0x5e5   : > { %v1282_v0 = vsel %vm922_vm4, %v1278_v63, -inf }
 0x5e6   : > { %1283 = vmax.xlane.f32.xlu1 %v1282_v0  ;;  %v2007_v1 = vpop.f32.mrf.mxu0 }
 0x5f7   : > { %1293 = vrot.lane.b32.xlu1 %v2966_v35, %s2553_s20  ;;  %s1653_s20 = scalar_lea.sflag [#allocation7], %s2883_s23 }
 0x5fb   : > { %1481 = vrot.lane.b32.xlu1 %v2962_v34, %s2554_s8 }
 0x5ff   : > { %1479 = vrot.lane.b32.xlu1 %v2966_v35, %s2554_s8  ;;  %s2407_s8 = scalar_lea.vmem %s1669_s6, 128 }
 0x600   : > { %p2408_p5 = scmp.ne.s32.totalorder %s1669_s6, %s2407_s8 }
 0x602   : > { %p2409_p12 = pnand %p2408_p5, %p3200_p4 }
 0x604   : > { %p2410_p0 = pneg %p2409_p12 }
 0x623   : > { %1103 = vadd.xlane.f32.xlu1 %v1102_v2 }
 0x66f   : > { %v1284_v3 = vpop.xlane.xlu1 %1283 }
 0x670   : > { %v1285_v4 = vsub.f32 %v1278_v63, %v1284_v3 }
 0x672   : > { %v1286_v5 = vmul.f32 1.442695, %v1285_v4 }
 0x673   : > { %v1294_v6 = vpop.permute.xlu1 %1293 }
 0x674   : > { %2207 = vpow2.f32 %v1286_v5  ;;  %2011 = vmatpush3.msra.mxu1 %v1294_v6 }
 0x675   : > { %2015 = vmatprep.subr.mxu1 %v2550_v23 }
 0x677   : > { %v1482_v7 = vpop.permute.xlu1 %1481 }
 0x678   : > { %2023 = vmatpush3.msra.mxu0 %v1482_v7 }
 0x679   : > { %2024 = vmatprep.subr.mxu0 %v2550_v23 }
 0x67b   : > { %v1480_v8 = vpop.permute.xlu1 %1479 }
 0x67c   : > { %2025 = vmatpush3.msra.mxu0 %v1480_v8 }
 0x67d   : > { %2029 = vmatprep.subr.mxu0 %v2550_v23 }
 0x681   : > { %v2208_v10 = vpop.eup %2207 }
 0x682   : > { %2013 = vmatmul.mubr.msk.f32.vlgmr.msra.gmra.mxu1 %vm922_vm4, %v2208_v10  ;;  %v1288_v18 = vsel %vm922_vm4, %v2208_v10, 0.0 }
 0x683   : > { %2016 = vmatpush3.xpose.msk.msra.mxu1 %vm842_vm2, %v1391_v9  ;;  %2019 = vmatprep.mubr.msk.f32.mxu1 %vm2551_vm1, %v2550_v23 }
 0x684   : > { %2017 = vmatprep.subr.mxu1 %v2550_v23 }
 0x687   : > { %2018 = vmatpush3.xpose.msk.msra.mxu1 %vm842_vm2, %v1389_v11 }
 0x68a   : > { %2020 = vmatmul.mubr.msk.f32.vlgmr.msra.gmra.mxu1 %vm842_vm2, %v1385_v12 }
 0x6ac   : > { %v1104_v29 = vpop.xlane.xlu1 %1103 }
 0x742   : > { %v1368_v13 = vpop.f32.mrf.mxu1 }
 0x744   : > { %v2014_v14 = vpop.f32.mrf.mxu1 }
 0x74a   : > { %v1464_v15 = vpop.f32.mrf.mxu1 }
 0x74b   : > { %v1468_v16 = vsel %vm922_vm4, %v1464_v15, -inf }
 0x74c   : > { %1469 = vmax.xlane.f32.xlu0 %v1468_v16  ;;  %v2021_v17 = vpop.f32.mrf.mxu1 }
 0x750   : > { %1289 = vadd.xlane.f32.xlu0 %v1288_v18 }
 0x7d5   : > { %v1470_v19 = vpop.xlane.xlu0 %1469 }
 0x7d6   : > { %v1471_v20 = vsub.f32 %v1464_v15, %v1470_v19 }
 0x7d8   : > { %v1472_v21 = vmul.f32 1.442695, %v1471_v20 }
 0x7d9   : > { %v1290_v22 = vpop.xlane.xlu0 %1289 }
 0x7da   : > { %2209 = vpow2.f32 %v1472_v21 }
 0x7db   : > { %2211 = vrcp.f32 %v1290_v22 }
 0x7dc   : > { %2213 = vrcp.f32 %v1104_v29 }
 0x7e7   : > { %v2210_v24 = vpop.eup %2209 }
 0x7e8   : > { %v2212_v25 = vpop.eup %2211  ;;  %2027 = vmatmul.mubr.msk.f32.vlgmr.msra.gmra.mxu0 %vm922_vm4, %v2210_v24  ;;  %v1474_v26 = vsel %vm922_vm4, %v2210_v24, 0.0 }
 0x7e9   : > { %1475 = vadd.xlane.f32.xlu0 %v1474_v26  ;;  %v1373_v27 = vmul.f32 %v2212_v25, %v1368_v13  ;;  %2037 = vmatprep.mubr.msk.f32.mxu0 %vm2551_vm1, %v2550_v23  ;;  %v2214_v30 = vpop.eup %2213 }
 0x7ea   : > { %v1187_v31 = vmul.f32 %v2214_v30, %v1182_v61  ;;  %2030 = vmatpush3.msra.mxu0 %v1570_v38 }
 0x7eb   : > { %1375 = vrot.lane.b32.xlu1 %v1373_v27, %s2555_s7  ;;  %2031 = vmatprep.subr.mxu0 %v2550_v23  ;;  %s2558_s7 = smov [#allocation17]  }
 0x7ec   : > { %2032 = vmatpush3.msra.mxu0 %v1569_v39 }
 0x7ed   : > { %930 = vadd.xlane.f32.xlu0 %v929_v28  ;;  %2033 = vmatprep.subr.mxu0 %v2550_v23 }
 0x7ee   : > { %2034 = vmatpush3.msra.mxu0 %v1568_v40 }
 0x7ef   : > { %2035 = vmatprep.subr.mxu0 %v2550_v23  ;;  %v1885_v23 = vld [vmem:[%s3198_s15] ss:$0 sm:$0xff] }
 0x7f0   : > { %2036 = vmatpush3.msra.mxu0 %v1567_v41 }
 0x803   : > { %1189 = vrot.lane.b32.xlu0 %v1187_v31, %s2556_s29  ;;  %s2411_s29 = sshll.u32 %s2558_s7, 4  ;;  %s2412_s29 = int_to_ptr.vmem [resolvable:$false] %s2411_s29 }
 0x804   : > { %s2413_s3 = scalar_lea.vmem %s2412_s29, 256  ;;  %p2414_p8 = scmp.lt.s32.totalorder %s1669_s6, %s2412_s29 }
 0x805   : > { %p2415_p1 = scmp.lt.s32.totalorder %s2413_s3, %s2407_s8 }
 0x807   : > { %p2416_p9 = por %p2415_p1, %p2414_p8 }
 0x809   : > { %p2417_p11 = pnand %p2416_p9, %p2410_p0 }
 0x85d   : > { %v1376_v37 = vpop.permute.xlu1 %1375 }
 0x872   : > { %v1476_v32 = vpop.xlane.xlu0 %1475 }
 0x876   : > { %v931_v33 = vpop.xlane.xlu0 %930 }
 0x877   : > { %2215 = vrcp.f32 %v931_v33 }
 0x878   : > { %2217 = vrcp.f32 %v1476_v32 }
 0x87a   : > { %v1190_v36 = vpop.permute.xlu0 %1189 }
 0x884   : > { %v2216_v34 = vpop.eup %2215 }
 0x885   : > { %v1006_v35 = vmul.f32 %v2216_v34, %v3000_v52  ;;  %v2218_v42 = vpop.eup %2217 }
 0x887   : > { %1007 = vst.msk [vmem:[#allocation4] sm:$0xff] %vm842_vm2, %v1006_v35 }
 0x888   : > { %1193 = vst.msk [vmem:[#allocation4] sm:$0xff] %vm1192_vm5, %v1190_v36 }
 0x889   : > { %1379 = vst.msk [vmem:[#allocation4] sm:$0xff] %vm1378_vm6, %v1376_v37 }
 0x8a8   : > { %v1554_v43 = vpop.f32.mrf.mxu0 }
 0x8a9   : > { %v1559_v44 = vmul.f32 %v2218_v42, %v1554_v43 }
 0x8aa   : > { %v2028_v45 = vpop.f32.mrf.mxu0 }
 0x8ab   : > { %1561 = vrot.lane.b32.xlu1 %v1559_v44, %s2557_s9 }
 0x91d   : > { %v1562_v46 = vpop.permute.xlu1 %1561 }
 0x91e   : > { %1565 = vst.msk [vmem:[#allocation4] sm:$0xff] %vm1564_vm7, %v1562_v46 }
 0x925   : > { %v1566_v47 = vld [vmem:[#allocation4] sm:$0xff] }
 0x926   : > { %2038 = vmatmul.mubr.msk.f32.vlgmr.msra.gmra.mxu0 %vm764_vm3, %v1566_v47 }
 0x9e6   : > { %v1647_v48 = vpop.f32.mrf.mxu0 }
 0x9e7   : > { %v1648_v49 = vadd.f32 %v1885_v23, %v1647_v48 }
 0x9e8   : > { %v2039_v50 = vpop.f32.mrf.mxu0 }
 0x9e9   : > { %1651 = vst.msk [vmem:[%s2911_s24] sm:$0xff] %vm764_vm3, %v1648_v49 }
 0x9ea   : > { %2420 = shalt.err (!%p2417_p11)
}
 0x9eb   : > { %s2421_s24 = scalar_lea.hbm %s3054_s17, 128  ;;  %s2425_s9 = scalar_lea.hbm %s3199_s4, 512 }
 0x9ec   : > { %p2422_p3 = scmp.ne.s32.totalorder %s3054_s17, %s2421_s24  ;;  %p2426_p2 = scmp.lt.s32.totalorder %s3054_s17, %s3199_s4 }
 0x9ed   : > { %p2427_p13 = scmp.lt.s32.totalorder %s2425_s9, %s2421_s24 }
 0x9ee   : > { %p2423_p7 = pnand %p2422_p3, %p3200_p4 }
 0x9ef   : > { %p2428_p6 = por %p2427_p13, %p2426_p2 }
 0x9f0   : > { %p2424_p10 = pneg %p2423_p7 }
 0x9f2   : > { %p2429_p5 = pnand %p2428_p6, %p2424_p10 }
 0x9f4   : > { %2432 = shalt.err (!%p2429_p5)
}
 0x9f5   : > { %2062 = dma.vmem_to_hbm [thread:$0]  (%p3200_p4), %s1669_s6, 128, %s3054_s17, %s1653_s20  }
 0x9f6 PF: > { %s3201_s18 = sld [smem:[#allocation24_spill]]  ;;  %p2100_p12 = scmp.ge.s32.totalorder %s2539_s27, 2 }
 0x9f7   : > { %p3202_p0 = scmp.ne.s32.totalorder %s3179_s30, 0 }
 0x9f9   : > { %p2088_p8 = pnand %p2100_p12, %p3202_p0 }
 0x9fb   : > { %p2089_p1 = pneg %p2088_p8 }
 0x9fc   : > { %s1680_s1 = sand.u32 1, %s3201_s18  }
 0x9fd   : > { %s1681_s15 = scalar_lea.sflag [#allocation7], %s1680_s1 }
 0x9fe   : > { %2494 = dma.done.wait (%p2089_p1), %s1681_s15, 128  }
 0x9ff   : > { %2496 = vsyncadd (%p2089_p1), %s1681_s15, 4294967168  ;;  %s32_s27 = sadd.s32 1, %s2539_s27   ;;  %s3203_s17 = sld [smem:[#allocation23_spill]] }
 0xa00   : > { %p29_p9 = scmp.ge.s32.totalorder %s32_s27, 6   ;;  %s3204_s12 = sld [smem:[#allocation29_spill]] }
 0xa01   : > { %s3205_s13 = sld [smem:[#allocation30_spill]]  ;;  %s3206_s18 = smov %s2507_s19 }
 0xa02   : > { %s3207_s19 = smov %s2831_s2  ;;  %s3208_s20 = smov %s2515_s21 }
 0xa03   : > { %s3209_s21 = smov %s2519_s22  ;;  %s3210_s22 = smov %s2834_s5 }
 0xa04   : > { %s3211_s23 = smov %s2531_s25  ;;  %s3212_s24 = smov %s2535_s26 }
 0xa05   :  { %31 = sbr.rel (!%p29_p9) target bundleno = 25 (0x19), region = 153 }
 0xa06   : > { %s3213_s25 = smov %s3204_s12 }
 0xa07   : > { %s3214_s26 = smov %s3205_s13 }
 0xa0a   :  { %1686 = vsyncpa [#allocation6], 1 }
 0xa0b   :  { %1688 = vsyncpa [#allocation6 + $0x1], 1 }
 0xa0c   :  { %1689 = vsyncpa [#allocation9], 1 }
 0xa0d   :  { %1691 = vsyncpa [#allocation9 + $0x1], 1 }
 0xa0e   :  { %1692 = vsyncpa [#allocation12], 1 }
 0xa0f   :  { %1693 = vsyncpa [#allocation15], 1 }
 0xa10   :  { %1694 = vsyncpa [#allocation7], 1 }
 0xa11   :  { %1696 = vsyncpa [#allocation7 + $0x1], 1 }

// kernel: tpu_custom_call.1
= control target key start
LH: loop header
LB: loop body
LE: loop exit
PB: predicated region body
PF: predicated region fallthrough
CT: control target
= control target key end

     0   :  { %s3112_s0 = inlined_call_operand.hbm [shape: f32[2,16,32], index: 0, kind: input, shape index: {}]   ;;  %s3113_s1 = inlined_call_operand.hbm [shape: f32[2,16,32], index: 1, kind: input, shape index: {}]   ;;  %s3114_s2 = inlined_call_operand.hbm [shape: f32[2,16,32], index: 2, kind: input, shape index: {}]   ;;  %s3115_s3 = inlined_call_operand.hbm [shape: f32[32,32], index: 3, kind: input, shape index: {}]   ;;  %s3116_s4 = inlined_call_operand.vmem [shape: f32[1,32], index: 4, kind: input, shape index: {}]   ;;  %s3117_s5 = inlined_call_operand.hbm [shape: f32[32,32], index: 5, kind: input, shape index: {}]   ;;  %s3118_s6 = inlined_call_operand.vmem [shape: f32[1,32], index: 6, kind: input, shape index: {}]   ;;  %s3119_s7 = inlined_call_operand.hbm [shape: f32[32,32], index: 7, kind: input, shape index: {}]   ;;  %s3120_s8 = inlined_call_operand.vmem [shape: f32[1,32], index: 8, kind: input, shape index: {}]   ;;  %s3121_s9 = inlined_call_operand.hbm [shape: f32[32,32], index: 9, kind: input, shape index: {}]   ;;  %s3122_s10 = inlined_call_operand.vmem [shape: f32[1,32], index: 10, kind: input, shape index: {}]   ;;  %s3123_s11 = inlined_call_operand.hbm [shape: f32[2,16,32], index: 11, kind: output, shape index: {}]  }
   0x1   :  { %3143 = sst [smem:[#allocation32_spill]] %s3113_s1 }
   0x2   :  { %3144 = sst [smem:[#allocation33_spill]] %s3114_s2 }
   0x3   :  { %3145 = sst [smem:[#allocation34_spill]] %s3115_s3 }
   0x4   :  { %3146 = sst [smem:[#allocation35_spill]] %s3116_s4 }
   0x5   :  { %3147 = sst [smem:[#allocation36_spill]] %s3117_s5 }
   0x6   :  { %3148 = sst [smem:[#allocation37_spill]] %s3118_s6 }
   0x7   :  { %3149 = sst [smem:[#allocation38_spill]] %s3119_s7 }
   0x8   :  { %3150 = sst [smem:[#allocation39_spill]] %s3120_s8 }
   0x9   :  { %3151 = sst [smem:[#allocation40_spill]] %s3121_s9 }
   0xa   :  { %3152 = sst [smem:[#allocation41_spill]] %s3122_s10 }
   0xb   :  { %3153 = sst [smem:[#allocation42_spill]] %s3123_s11 }
   0xc   :  { %16 = vsyncpa [#allocation6], 0 }
   0xd   :  { %18 = vsyncpa [#allocation6 + $0x1], 0 }
   0xe   :  { %19 = vsyncpa [#allocation9], 0 }
   0xf   :  { %21 = vsyncpa [#allocation9 + $0x1], 0 }
  0x10   :  { %22 = vsyncpa [#allocation12], 0 }
  0x11   :  { %23 = vsyncpa [#allocation15], 0 }
  0x12   :  { %24 = vsyncpa [#allocation7], 0 }
  0x13   :  { %26 = vsyncpa [#allocation7 + $0x1], 0  ;;  %s2619_s17 = smov 0   ;;  %s2621_s18 = smov 0  }
  0x14   :  { %s2623_s19 = smov 0   ;;  %s2625_s20 = smov 0  }
  0x15   :  { %s2627_s21 = smov 0   ;;  %s2629_s22 = smov 0  }
  0x16   :  { %s2631_s23 = smov 0   ;;  %s2633_s24 = smov 0  }
  0x17   :  { %s2635_s25 = smov 0   ;;  %s2637_s26 = smov 0  }
  0x18   :  { %s2639_s27 = smov 0  }
  0x19 LB: > { %3154 = sst [smem:[#allocation23_spill]] %s2503_s18  ;;  %s2675_s28 = sadd.s32 4294967295, %s2539_s27   ;;  %s2539_s27 = sphi %s2639_s27, %s32_s27   ;;  %s2535_s26 = sphi %s2637_s26, %s3214_s26   ;;  %s2531_s25 = sphi %s2635_s25, %s3213_s25   ;;  %s2527_s24 = sphi %s2633_s24, %s3212_s24   ;;  %s2523_s23 = sphi %s2631_s23, %s3211_s23   ;;  %s2519_s22 = sphi %s2629_s22, %s3210_s22   ;;  %s2515_s21 = sphi %s2627_s21, %s3209_s21   ;;  %s2511_s20 = sphi %s2625_s20, %s3208_s20   ;;  %s2507_s19 = sphi %s2623_s19, %s3207_s19   ;;  %s2503_s18 = sphi %s2621_s18, %s3206_s18   ;;  %s2499_s17 = sphi %s2619_s17, %s3203_s17  }
  0x1a   : > { %3155 = sst [smem:[#allocation24_spill]] %s2511_s20  ;;  %p1836_p0 = scmp.ge.s32.totalorder %s2539_s27, 1 }
  0x1b   : > { %3156 = sst [smem:[#allocation25_spill]] %s2523_s23  ;;  %p3130_p1 = scmp.eq.s32.totalorder %s2675_s28, 0 }
  0x1c   : > { %3157 = sst [smem:[#allocation26_spill]] %s2527_s24  ;;  %p325_p2 = scmp.lt.s32.totalorder %s2539_s27, 5 }
  0x1d   : > { %s2541_s30 = smov [#allocation11]   ;;  %s2542_s14 = smov [#allocation14]  }
  0x1e   : > { %p2680_p3 = pnand %p1836_p0, %p325_p2  ;;  %s337_s12 = sshll.u32 %s2541_s30, 4  ;;  %s338_s12 = int_to_ptr.vmem [resolvable:$true] %s337_s12 }
  0x1f   : > { %s369_s15 = sshll.u32 %s2542_s14, 4  ;;  %s2230_s16 = scalar_lea.vmem %s338_s12, 512  ;;  %s370_s15 = int_to_ptr.vmem [resolvable:$true] %s369_s15 }
  0x20   : > { %s3158_s29 = scalar_select %p2680_p3, 1, 0 }
  0x21   : > { %p2064_p4 = pneg %p2680_p3  ;;  %p2231_p7 = scmp.ne.s32.totalorder %s338_s12, %s2230_s16 }
  0x22   : > { %3159 = sst [smem:[#allocation27_spill]] %s3158_s29  ;;  %p2238_p10 = scmp.lt.s32.totalorder %s338_s12, %s338_s12 }
  0x23   : > { %p2688_p5 = pnand %p2064_p4, %p3130_p1  ;;  %p2239_p11 = scmp.lt.s32.totalorder %s2230_s16, %s2230_s16 }
  0x25   : > { %p2221_p6 = pneg %p2688_p5  ;;  %p2240_p12 = por %p2239_p11, %p2238_p10 }
  0x27   : > { %p2233_p8 = pnand %p2231_p7, %p2221_p6 }
  0x29   : > { %p2234_p9 = pneg %p2233_p8 }
  0x2b   : > { %p2241_p13 = pnand %p2240_p12, %p2234_p9 }
  0x2d   : > { %2244 = shalt.err (!%p2241_p13)
}
  0x2e   : > { %s3125_s30 = smov 128   ;;  %s3127_s11 = smov 8  }
  0x2f   : > { %s3161_s3 = sld [smem:[#allocation34_spill]]  ;;  %s2256_s24 = scalar_lea.vmem %s370_s15, 512 }
  0x30   : > { %p2257_p0 = scmp.ne.s32.totalorder %s370_s15, %s2256_s24  ;;  %p2264_p7 = scmp.lt.s32.totalorder %s370_s15, %s370_s15 }
  0x31   : > { %p2265_p8 = scmp.lt.s32.totalorder %s2256_s24, %s2256_s24 }
  0x32   : > { %p2259_p2 = pnand %p2257_p0, %p2221_p6 }
  0x33   : > { %p2266_p9 = por %p2265_p8, %p2264_p7 }
  0x34   : > { %p2260_p4 = pneg %p2259_p2 }
  0x35   : > { %2067 = dma.hbm_to_vmem [thread:$0]  (!%p2688_p5), %s3161_s3, 512, %s338_s12, [#allocation12], %s3125_s30, %s3125_s30, %s3127_s11  }
  0x36   : > { %p2267_p10 = pnand %p2266_p9, %p2260_p4 }
  0x38   : > { %2270 = shalt.err (!%p2267_p10)
}
  0x39   : > { %s3162_s7 = sld [smem:[#allocation38_spill]]  ;;  %p61_p11 = scmp.eq.s32.totalorder %s2539_s27, 0 }
  0x3a   : > { %p86_p12 = scmp.ne.s32.totalorder %s2507_s19, %s2503_s18  ;;  %p92_p13 = scmp.ne.s32.totalorder %s2503_s18, %s2499_s17 }
  0x3b   : > { %p3129_p0 = scmp.lt.s32.totalorder %s2539_s27, 4  ;;  %s422_s4 = sand.u32 1, %s2539_s27  }
  0x3c   : > { %p88_p2 = por %p86_p12, %p61_p11  ;;  %p2727_p4 = por %p92_p13, %p3130_p1 }
  0x3d   : > { %s424_s24 = sand.u32 1, %s2507_s19   ;;  %s1892_s12 = sshll.u32 %s2535_s26, 8 }
  0x3e   : > { %s3163_s10 = scalar_select %p2727_p4, 1, 0 }
  0x3f   : > { %2073 = dma.hbm_to_vmem [thread:$0]  (!%p2688_p5), %s3162_s7, 512, %s370_s15, [#allocation15], %s3125_s30, %s3125_s30, %s3127_s11  }
  0x40   : > { %3164 = sst [smem:[#allocation28_spill]] %s3163_s10  ;;  %s1845_s14 = sshll.u32 %s424_s24, 4 }
  0x41   : > { %s3165_s1 = sld [smem:[#allocation32_spill]]  ;;  %p2738_p7 = pnand %p3129_p0, %p88_p2 }
  0x42   : > { %s426_s17 = scalar_lea.vmem [#allocation8], %s1845_s14  ;;  %s2742_s11 = scalar_lea.sflag [#allocation9], %s422_s4 }
  0x43   : > { %s433_s30 = sshll.u32 %s426_s17, 4  ;;  %p3135_p8 = pneg %p2738_p7  ;;  %s434_s30 = int_to_ptr.vmem [resolvable:$true] %s433_s30 }
  0x44   : > { %s2284_s7 = scalar_lea.vmem %s434_s30, 256  ;;  %s2545_s3 = smov [#allocation8]  }
  0x45   : > { %p2285_p9 = scmp.ne.s32.totalorder %s434_s30, %s2284_s7  ;;  %s2289_s24 = sshll.u32 %s2545_s3, 4  ;;  %s2290_s24 = int_to_ptr.vmem [resolvable:$false] %s2289_s24 }
  0x46   : > { %s2291_s16 = scalar_lea.vmem %s2290_s24, 512  ;;  %p2292_p13 = scmp.lt.s32.totalorder %s434_s30, %s2290_s24 }
  0x47   : > { %s432_s8 = scalar_lea.hbm %s3165_s1, %s1892_s12  ;;  %p2287_p10 = pnand %p2285_p9, %p3135_p8 }
  0x48   : > { %p2293_p2 = scmp.lt.s32.totalorder %s2291_s16, %s2284_s7 }
  0x49   : > { %p2288_p12 = pneg %p2287_p10 }
  0x4a   : > { %p2294_p0 = por %p2293_p2, %p2292_p13 }
  0x4c   : > { %p2295_p1 = pnand %p2294_p0, %p2288_p12 }
  0x4e   : > { %2298 = shalt.err (!%p2295_p1)
}
  0x4f   : > { %s3167_s4 = smov 8   ;;  %s3168_s17 = smov 128  }
  0x50   : > { %2083 = dma.hbm_to_vmem [thread:$0]  (!%p2738_p7), %s432_s8, 256, %s434_s30, %s2742_s11, %s3168_s17, %s3168_s17, %s3167_s4  }
  0x51   : > { %s3169_s2 = sld [smem:[#allocation33_spill]]  ;;  %s447_s3 = scalar_lea.vmem [#allocation10], %s1845_s14 }
  0x52   : > { %s454_s10 = sshll.u32 %s447_s3, 4  ;;  %s2546_s7 = smov [#allocation13]   ;;  %s2760_s10 = int_to_ptr.vmem [resolvable:$true] %s454_s10 }
  0x53   : > { %s353_s24 = sshll.u32 %s2546_s7, 4  ;;  %s2547_s16 = smov [#allocation16]   ;;  %s354_s24 = int_to_ptr.vmem [resolvable:$true] %s353_s24 }
  0x54   : > { %s385_s18 = sshll.u32 %s2547_s16, 4  ;;  %s2310_s29 = scalar_lea.vmem %s354_s24, 512  ;;  %s386_s18 = int_to_ptr.vmem [resolvable:$true] %s385_s18 }
  0x55   : > { %p2311_p1 = scmp.ne.s32.totalorder %s354_s24, %s2310_s29  ;;  %p2318_p10 = scmp.lt.s32.totalorder %s354_s24, %s354_s24 }
  0x56   : > { %p2319_p12 = scmp.lt.s32.totalorder %s2310_s29, %s2310_s29 }
  0x57   : > { %s2758_s23 = scalar_lea.hbm %s3169_s2, %s1892_s12  ;;  %p2313_p0 = pnand %p2311_p1, %p2221_p6 }
  0x58   : > { %p2320_p13 = por %p2319_p12, %p2318_p10 }
  0x59   : > { %p2314_p9 = pneg %p2313_p0 }
  0x5b   : > { %p2321_p2 = pnand %p2320_p13, %p2314_p9 }
  0x5d   : > { %2324 = shalt.err (!%p2321_p2)
}
  0x5e   : > { %s3170_s5 = sld [smem:[#allocation36_spill]]  ;;  %s2336_s8 = scalar_lea.vmem %s386_s18, 512 }
  0x5f   : > { %p2337_p8 = scmp.ne.s32.totalorder %s386_s18, %s2336_s8  ;;  %p2344_p10 = scmp.lt.s32.totalorder %s386_s18, %s386_s18 }
  0x60   : > { %p2345_p9 = scmp.lt.s32.totalorder %s2336_s8, %s2336_s8 }
  0x61   : > { %p2339_p1 = pnand %p2337_p8, %p2221_p6 }
  0x62   : > { %p2346_p12 = por %p2345_p9, %p2344_p10 }
  0x63   : > { %p2340_p0 = pneg %p2339_p1 }
  0x64   : > { %2070 = dma.hbm_to_vmem [thread:$0]  (!%p2688_p5), %s3170_s5, 512, %s354_s24, [#allocation12], %s3168_s17, %s3168_s17, %s3167_s4  }
  0x65   : > { %p2347_p13 = pnand %p2346_p12, %p2340_p0 }
  0x67   : > { %2350 = shalt.err (!%p2347_p13)
}
  0x68   : > { %s3171_s9 = sld [smem:[#allocation40_spill]]  ;;  %s1835_s13 = sadd.s32 4294967294, %s2539_s27  }
  0x69   : > { %s41_s12 = sadd.s32 1, %s2531_s25  ;;  %s44_s14 = sadd.s32 1, %s2535_s26 }
  0x6a   : > { %p42_p6 = scmp.ge.s32.totalorder %s41_s12, 2  ;;  %s53_s3 = sadd.s32 1, %s2519_s22 }
  0x6b   : > { %p60_p8 = scmp.ne.s32.totalorder %s2519_s22, %s2515_s21  ;;  %p66_p2 = scmp.ne.s32.totalorder %s2515_s21, %s2511_s20 }
  0x6c   : > { %s3216_s12 = smov (%p42_p6, %s41_s12), 0  ;;  %s3218_s14 = smov (!%p42_p6, %s44_s14), %s2535_s26 }
  0x6d   : > { %3172 = sst [smem:[#allocation29_spill]] %s3216_s12  ;;  %s49_s7 = ssub.s32 %s2531_s25, %s3216_s12 }
  0x6e   : > { %2076 = dma.hbm_to_vmem [thread:$0]  (!%p2688_p5), %s3171_s9, 512, %s386_s18, [#allocation15], %s3168_s17, %s3168_s17, %s3167_s4  }
  0x6f   : > { %p2799_p5 = por %p61_p11, %p60_p8  ;;  %p46_p1 = scmp.ge.s32.totalorder %s3218_s14, 2 }
  0x70   : > { %p3174_p0 = scmp.eq.s32.totalorder %s2675_s28, 0  ;;  %s79_s16 = sadd.s32 1, %s2507_s19 }
  0x71   : > { %p312_p9 = scmp.eq.s32.totalorder %s2675_s28, 3  ;;  %s3220_s14 = smov (%p46_p1, %s3218_s14), 0 }
  0x72   : > { %p2808_p10 = por %p3174_p0, %p66_p2  ;;  %3176 = sst [smem:[#allocation30_spill]] %s3220_s14 }
  0x73   : > { %p2816_p12 = por %p312_p9, %p60_p8  ;;  %p318_p11 = scmp.eq.s32.totalorder %s1835_s13, 3 }
  0x74   : > { %s48_s6 = ssub.s32 %s2535_s26, %s3220_s14  ;;  %s402_s8 = sand.u32 1, %s2519_s22  }
  0x75   : > { %s3177_s1 = scalar_select %p2816_p12, 1, 0 }
  0x76   : > { %s50_s29 = sor.u32 %s49_s7, %s48_s6  ;;  %p77_p13 = scmp.eq.s32.totalorder %s48_s6, 0 }
  0x77   : > { %3178 = sst [smem:[#allocation31_spill]] %s3177_s1  ;;  %p51_p6 = scmp.eq.s32.totalorder %s50_s29, 0 }
  0x78   : > { %p2826_p0 = por %p318_p11, %p66_p2  ;;  %s1842_s13 = sshll.u32 %s402_s8, 3 }
  0x79   : > { %s2831_s2 = scalar_select %p77_p13, %s2507_s19, %s79_s16  }
  0x7a   : > { %s3179_s30 = scalar_select %p2826_p0, 1, 0 }
  0x7b   : > { %s2834_s5 = scalar_select %p51_p6, %s2519_s22, %s53_s3  }
  0x7c   : > { %s1843_s9 = sshll.u32 %s2535_s26, 1  ;;  %s406_s12 = scalar_lea.vmem [#allocation5], %s1842_s13 }
  0x7d   : > { %s411_s14 = sadd.s32 %s2531_s25, %s1843_s9  ;;  %s415_s7 = sshll.u32 %s406_s12, 4  ;;  %s2840_s7 = int_to_ptr.vmem [resolvable:$true] %s415_s7 }
  0x7e   : > { %s1844_s1 = sshll.u32 %s411_s14, 7  ;;  %p3180_p8 = scmp.lt.s32.totalorder %s2539_s27, 4 }
  0x7f   : > { %s2845_s20 = scalar_lea.hbm %s3112_s0, %s1844_s1  ;;  %s2364_s16 = scalar_lea.vmem %s2760_s10, 256 }
  0x80   : > { %p2851_p2 = pnand %p3180_p8, %p2799_p5  ;;  %p2365_p1 = scmp.ne.s32.totalorder %s2760_s10, %s2364_s16 }
  0x81   : > { %p3182_p9 = pneg %p2738_p7  ;;  %s2548_s9 = smov [#allocation10]  }
  0x82   : > { %s2369_s12 = sshll.u32 %s2548_s9, 4  ;;  %s2370_s12 = int_to_ptr.vmem [resolvable:$false] %s2369_s12 }
  0x83   : > { %p2367_p11 = pnand %p2365_p1, %p3182_p9  ;;  %s2371_s14 = scalar_lea.vmem %s2370_s12, 512 }
  0x84   : > { %p2372_p6 = scmp.lt.s32.totalorder %s2760_s10, %s2370_s12  ;;  %p2373_p0 = scmp.lt.s32.totalorder %s2371_s14, %s2364_s16 }
  0x85   : > { %p2368_p13 = pneg %p2367_p11 }
  0x86   : > { %p2374_p12 = por %p2373_p0, %p2372_p6 }
  0x88   : > { %p2375_p4 = pnand %p2374_p12, %p2368_p13 }
  0x8a   : > { %2378 = shalt.err (!%p2375_p4)
}
  0x8b   : > { %2086 = dma.hbm_to_vmem [thread:$0]  (!%p2738_p7), %s2758_s23, 256, %s2760_s10, %s2742_s11, %s3168_s17, %s3168_s17, %s3167_s4  }
  0x8c   : > { %s403_s18 = scalar_lea.sflag [#allocation6], %s402_s8  ;;  %p2381_p5 = pneg %p2851_p2 }
  0x8d   : > { %s2392_s1 = scalar_lea.vmem %s2840_s7, 128  ;;  %s2549_s15 = smov [#allocation5]  }
  0x8e   : > { %p2393_p4 = scmp.ne.s32.totalorder %s2840_s7, %s2392_s1  ;;  %s2397_s13 = sshll.u32 %s2549_s15, 4  ;;  %s2398_s13 = int_to_ptr.vmem [resolvable:$false] %s2397_s13 }
  0x8f   : > { %s2399_s6 = scalar_lea.vmem %s2398_s13, 256  ;;  %p2400_p8 = scmp.lt.s32.totalorder %s2840_s7, %s2398_s13 }
  0x90   : > { %p2395_p12 = pnand %p2393_p4, %p2381_p5  ;;  %p2401_p1 = scmp.lt.s32.totalorder %s2399_s6, %s2392_s1 }
  0x92   : > { %p2396_p0 = pneg %p2395_p12  ;;  %p2402_p9 = por %p2401_p1, %p2400_p8 }
  0x94   : > { %p2403_p11 = pnand %p2402_p9, %p2396_p0 }
  0x96   : > { %2406 = shalt.err (!%p2403_p11)
}
  0x97   : > { %2080 = dma.hbm_to_vmem [thread:$0]  (!%p2851_p2), %s2845_s20, 128, %s2840_s7, %s403_s18  }
  0x98   : > { %466 = sbr.rel (%p2680_p3) target bundleno = 2550 (0x9f6), region = 64  ;;  %s2883_s23 = sand.u32 (!%p2680_p3), 1, %s2515_s21  }
  0x99   : > { %s1852_s10 = sshll.u32 (!%p2680_p3), %s2883_s23, 3  ;;  %s469_s4 = scalar_lea.sflag (!%p2680_p3), [#allocation6], %s2883_s23 }
  0x9a   : > { %s2887_s17 = scalar_lea.vmem (!%p2680_p3), [#allocation5], %s1852_s10 }
  0x9d   : > { %2478 = dma.done.wait (%p2808_p10), %s469_s4, 128  }
  0x9e   : > { %2480 = vsyncadd (%p2808_p10), %s469_s4, 4294967168  ;;  %s3184_s20 = sld [smem:[#allocation23_spill]]  ;;  %s477_s7 = sand.u32 1, %s2675_s28  }
  0x9f   : > { %s3185_s8 = sld [smem:[#allocation28_spill]]  ;;  %s478_s16 = scalar_lea.sflag [#allocation9], %s477_s7 }
  0xa4   : > { %s479_s29 = sand.u32 1, %s3184_s20  }
  0xa5   : > { %s2895_s3 = sshll.u32 %s479_s29, 4  ;;  %p3186_p3 = scmp.ne.s32.totalorder %s3185_s8, 0 }
  0xa6   : > { %s481_s9 = scalar_lea.vmem [#allocation8], %s2895_s3 }
  0xa7   : > { %2482 = dma.done.wait (%p3186_p3), %s478_s16, 512  }
  0xa8   : > { %2484 = vsyncadd (%p3186_p3), %s478_s16, 4294966784  ;;  %s490_s12 = scalar_lea.vmem [#allocation10], %s2895_s3  ;;  %p3187_p7 = scmp.eq.s32.totalorder %s2675_s28, 0 }
  0xaa   : > { %2486 = dma.done.wait (%p3187_p7), [#allocation12], 1024   ;;  %p3188_p10 = pmov %p3187_p7 }
  0xab   : > { %p3189_p2 = pmov %p3187_p7 }
  0xac   : > { %2488 = vsyncadd (%p3188_p10), [#allocation12], 4294966272 }
  0xad   : > { %2490 = dma.done.wait (%p3189_p2), [#allocation15], 1024   ;;  %p3190_p13 = pmov %p3189_p2 }
  0xae   : > { %s2911_s24 = scalar_lea.vmem [#allocation17], %s1852_s10  ;;  %s3191_s14 = sld [smem:[#allocation25_spill]] }
  0xaf   : > { %2492 = vsyncadd (%p3190_p13), [#allocation15], 4294966272 }
  0xb4   : > { %p1860_p6 = scmp.ne.s32.totalorder %s3191_s14, 0 }
  0xb5   : > { %s3192_s1 = sld [smem:[#allocation37_spill]] (!%p1860_p6) }
  0xb6   : > { %558 = sbr.rel (%p1860_p6) target bundleno = 396 (0x18c), region = 96  ;;  %s3193_s6 = sld [smem:[#allocation39_spill]] (!%p1860_p6) }
  0xbb   : > { %v564_v0 = vld [vmem:[#allocation13 + $0x18] sm:$0xff]  ;;  %v563_v2 = vld [vmem:[#allocation13 + $0x10] sm:$0xff]  ;;  %v562_v4 = vld [vmem:[#allocation13 + $0x8] sm:$0xff]  ;;  %vm572_vm0 = vcmask 261120  }
  0xbc   : > { %v661_v1 = vld [vmem:[#allocation14 + $0x18] sm:$0xff]  ;;  %1940 = vmatprep.subr.mxu0 %v564_v0  ;;  %v660_v3 = vld [vmem:[#allocation14 + $0x10] sm:$0xff]  ;;  %v659_v5 = vld [vmem:[#allocation14 + $0x8] sm:$0xff] }
  0xbd   : > { %1951 = vmatprep.subr.mxu1 %v661_v1  ;;  %1941 = vmatpush3.msra.mxu0 %v564_v0  ;;  %v561_v6 = vld [vmem:[#allocation13] sm:$0xff]  ;;  %v560_v10 = vld [vmem:[%s481_s9 + $0x8] sm:$0xff] }
  0xbe   : > { %1952 = vmatpush3.msra.mxu1 %v661_v1  ;;  %1942 = vmatprep.subr.mxu0 %v563_v2  ;;  %v658_v7 = vld [vmem:[#allocation14] sm:$0xff]  ;;  %v657_v11 = vld [vmem:[%s490_s12 + $0x8] sm:$0xff] }
  0xbf   : > { %1953 = vmatprep.subr.mxu1 %v660_v3  ;;  %1943 = vmatpush3.msra.mxu0 %v563_v2  ;;  %v559_v8 = vld [vmem:[%s481_s9] sm:$0xff]  ;;  %v1861_v12 = vld [vmem:[%s3192_s1] ss:$0 sm:$0xff] }
  0xc0   : > { %1954 = vmatpush3.msra.mxu1 %v660_v3  ;;  %1944 = vmatprep.subr.mxu0 %v562_v4  ;;  %v656_v9 = vld [vmem:[%s490_s12] sm:$0xff]  ;;  %v1864_v13 = vld [vmem:[%s3193_s6] ss:$0 sm:$0xff] }
  0xc1   : > { %1955 = vmatprep.subr.mxu1 %v659_v5  ;;  %1945 = vmatpush3.msra.mxu0 %v562_v4 }
  0xc2   : > { %1956 = vmatpush3.msra.mxu1 %v659_v5  ;;  %1946 = vmatprep.subr.mxu0 %v561_v6 }
  0xc3   : > { %1957 = vmatprep.subr.mxu1 %v658_v7  ;;  %1947 = vmatpush3.msra.mxu0 %v561_v6 }
  0xc4   : > { %1948 = vmatprep.mubr.msk.f32.mxu0 %vm572_vm0, %v559_v8  ;;  %1958 = vmatpush3.msra.mxu1 %v658_v7 }
  0xc5   : > { %1959 = vmatprep.mubr.msk.f32.mxu1 %vm572_vm0, %v656_v9  ;;  %1949 = vmatmul.mubr.msk.f32.vlgmr.msra.gmra.mxu0 %vm572_vm0, %v560_v10 }
  0xc6   : > { %1960 = vmatmul.mubr.msk.f32.vlgmr.msra.gmra.mxu1 %vm572_vm0, %v657_v11 }
 0x185   : > { %v1950_v14 = vpop.f32.mrf.mxu0 }
 0x186   : > { %v1961_v15 = vpop.f32.mrf.mxu1  ;;  %v651_v16 = vadd.f32 %v1950_v14, %v1861_v12 }
 0x187   : > { %v747_v17 = vadd.f32 %v1961_v15, %v1864_v13  ;;  %v645_v18 = vpop.f32.mrf.mxu0 }
 0x188   : > { %v741_v19 = vpop.f32.mrf.mxu1  ;;  %655 = vst.msk [vmem:[#allocation2 + $0x8] sm:$0xff] %vm572_vm0, %v651_v16  ;;  %v646_v20 = vadd.f32 %v1861_v12, %v645_v18 }
 0x189   : > { %751 = vst.msk [vmem:[#allocation3 + $0x8] sm:$0xff] %vm572_vm0, %v747_v17  ;;  %v742_v21 = vadd.f32 %v1864_v13, %v741_v19 }
 0x18a   : > { %654 = vst.msk [vmem:[#allocation2] sm:$0xff] %vm572_vm0, %v646_v20 }
 0x18b   : > { %750 = vst.msk [vmem:[#allocation3] sm:$0xff] %vm572_vm0, %v742_v21 }
 0x18c PF: > { %v756_v22 = vld [vmem:[#allocation11 + $0x18] sm:$0xff]  ;;  %v2550_v23 = vmov 0.0   ;;  %v755_v24 = vld [vmem:[#allocation11 + $0x10] sm:$0xff]  ;;  %vm2551_vm1 = vmmov 0   ;;  %vm842_vm2 = vcmask 64512   ;;  %v754_v27 = vld [vmem:[#allocation11 + $0x8] sm:$0xff] }
 0x18d   : > { %1962 = vmatprep.subr.mxu0 %v2550_v23  ;;  %1970 = vmatprep.mubr.msk.f32.mxu0 %vm2551_vm1, %v2550_v23  ;;  %s2552_s11 = smov 120   ;;  %v753_v28 = vld [vmem:[#allocation11] sm:$0xff]  ;;  %v752_v29 = vld [vmem:[%s2887_s17] sm:$0xff]  ;;  %vm764_vm3 = vcmask 261120   ;;  %s3194_s17 = sld [smem:[#allocation35_spill]]  ;;  %vm922_vm4 = vcmask 130048  }
 0x18e   : > { %1963 = vmatpush3.msra.mxu0 %v756_v22  ;;  %1973 = vmatprep.subr.mxu1 %v2550_v23  ;;  %s2553_s20 = smov 112   ;;  %s2554_s8 = smov 104   ;;  %vm1192_vm5 = vcmask 130112   ;;  %vm1378_vm6 = vcmask 195712   ;;  %vm1564_vm7 = vcmask 261312  }
 0x18f   : > { %v839_v25 = vld [vmem:[#allocation2 + $0x8] sm:$0xff]  ;;  %1964 = vmatprep.subr.mxu0 %v2550_v23  ;;  %1977 = vmatprep.mubr.msk.f32.mxu1 %vm2551_vm1, %v2550_v23  ;;  %s2555_s7 = smov 16   ;;  %s2556_s29 = smov 8  }
 0x190   : > { %1974 = vmatpush3.xpose.msk.msra.mxu1 %vm842_vm2, %v839_v25  ;;  %1965 = vmatpush3.msra.mxu0 %v755_v24  ;;  %v2962_v34 = vld [vmem:[#allocation3 + $0x8] sm:$0xff]  ;;  %s3195_s3 = sld [smem:[#allocation26_spill]]  ;;  %s2557_s9 = smov 24  }
 0x191   : > { %v1008_v26 = vld [vmem:[#allocation2] sm:$0xff]  ;;  %1966 = vmatprep.subr.mxu0 %v2550_v23  ;;  %1975 = vmatprep.subr.mxu1 %v2550_v23  ;;  %s3196_s16 = sld [smem:[#allocation25_spill]]  ;;  %s1668_s6 = sshll.u32 %s2911_s24, 4  ;;  %s1669_s6 = int_to_ptr.vmem [resolvable:$true] %s1668_s6 }
 0x192   : > { %1016 = vrot.lane.b32.xlu1 %v1008_v26, %s2552_s11  ;;  %1967 = vmatpush3.msra.mxu0 %v754_v27  ;;  %v2966_v35 = vld [vmem:[#allocation3] sm:$0xff]  ;;  %s3197_s12 = sld [smem:[#allocation31_spill]] }
 0x193   : > { %1968 = vmatprep.subr.mxu0 %v2550_v23  ;;  %v1867_v30 = vld [vmem:[%s3194_s17] ss:$0 sm:$0xff]  ;;  %s3198_s15 = sld [smem:[#allocation41_spill]] }
 0x194   : > { %1976 = vmatpush3.xpose.msk.msra.mxu1 %vm842_vm2, %v1008_v26  ;;  %1969 = vmatpush3.msra.mxu0 %v753_v28  ;;  %s3199_s4 = sld [smem:[#allocation42_spill]] }
 0x195   : > { %1980 = vmatprep.subr.mxu1 %v2550_v23  ;;  %1971 = vmatmul.mubr.msk.f32.vlgmr.msra.gmra.mxu0 %vm764_vm3, %v752_v29 }
 0x196   : > { %1994 = vmatprep.subr.mxu0 %v2550_v23  ;;  %1998 = vmatprep.mubr.msk.f32.mxu0 %vm2551_vm1, %v2550_v23  ;;  %s1888_s14 = sshll.u32 %s3195_s3, 1 }
 0x197   : > { %s1664_s28 = sadd.s32 %s3196_s16, %s1888_s14 }
 0x198   : > { %s1889_s13 = sshll.u32 %s1664_s28, 7  ;;  %p3200_p4 = scmp.ne.s32.totalorder %s3197_s12, 0 }
 0x19a   : > { %s3054_s17 = scalar_lea.hbm %s3199_s4, %s1889_s13 }
 0x204   : > { %v1017_v47 = vpop.permute.xlu1 %1016 }
 0x255   : > { %v834_v31 = vpop.f32.mrf.mxu0 }
 0x256   : > { %v835_v32 = vadd.f32 %v1867_v30, %v834_v31 }
 0x257   : > { %v1972_v33 = vpop.f32.mrf.mxu0 }
 0x258   : > { %1012 = vrot.lane.b32.xlu1 %v835_v32, %s2552_s11  ;;  %1978 = vmatmul.mubr.msk.f32.vlgmr.msra.gmra.mxu1 %vm842_vm2, %v835_v32 }
 0x259   : > { %1984 = vmatprep.mubr.msk.f32.mxu1 %vm2551_vm1, %v2550_v23  ;;  %1981 = vmatpush3.msra.mxu1 %v2962_v34 }
 0x25a   : > { %1982 = vmatprep.subr.mxu1 %v2550_v23 }
 0x25b   : > { %1983 = vmatpush3.msra.mxu1 %v2966_v35 }
 0x25c   : > { %1987 = vmatprep.subr.mxu1 %v2550_v23 }
 0x2ca   : > { %v1013_v50 = vpop.permute.xlu1 %1012 }
 0x318   : > { %v918_v36 = vpop.f32.mrf.mxu1 }
 0x319   : > { %v923_v37 = vsel %vm922_vm4, %v918_v36, -inf }
 0x31a   : > { %924 = vmax.xlane.f32.xlu0 %v923_v37  ;;  %v1979_v38 = vpop.f32.mrf.mxu1 }
 0x31b   : > { %v1570_v38 = vld [vmem:[#allocation16 + $0x18] sm:$0xff] }
 0x330   : > { %1018 = vrot.lane.b32.xlu0 %v839_v25, %s2552_s11 }
 0x334   : > { %1109 = vrot.lane.b32.xlu0 %v2962_v34, %s2552_s11 }
 0x338   : > { %1107 = vrot.lane.b32.xlu0 %v2966_v35, %s2552_s11 }
 0x33c   : > { %1204 = vrot.lane.b32.xlu0 %v839_v25, %s2553_s20 }
 0x340   : > { %1202 = vrot.lane.b32.xlu0 %v1008_v26, %s2553_s20 }
 0x344   : > { %1198 = vrot.lane.b32.xlu0 %v835_v32, %s2553_s20 }
 0x348   : > { %1295 = vrot.lane.b32.xlu0 %v2962_v34, %s2553_s20 }
 0x34c   : > { %1390 = vrot.lane.b32.xlu0 %v839_v25, %s2554_s8 }
 0x350   : > { %1388 = vrot.lane.b32.xlu0 %v1008_v26, %s2554_s8 }
 0x354   : > { %1384 = vrot.lane.b32.xlu0 %v835_v32, %s2554_s8 }
 0x3a3   : > { %v925_v39 = vpop.xlane.xlu0 %924 }
 0x3a4   : > { %v926_v40 = vsub.f32 %v918_v36, %v925_v39  ;;  %v1569_v39 = vld [vmem:[#allocation16 + $0x10] sm:$0xff] }
 0x3a6   : > { %v927_v41 = vmul.f32 1.442695, %v926_v40  ;;  %v1568_v40 = vld [vmem:[#allocation16 + $0x8] sm:$0xff] }
 0x3a7   : > { %v1019_v42 = vpop.permute.xlu0 %1018 }
 0x3a8   : > { %2203 = vpow2.f32 %v927_v41  ;;  %v1567_v41 = vld [vmem:[#allocation16] sm:$0xff] }
 0x3ab   : > { %v1110_v43 = vpop.permute.xlu0 %1109 }
 0x3ac   : > { %1995 = vmatpush3.msra.mxu0 %v1110_v43 }
 0x3ad   : > { %1996 = vmatprep.subr.mxu0 %v2550_v23 }
 0x3af   : > { %v1108_v44 = vpop.permute.xlu0 %1107 }
 0x3b0   : > { %1997 = vmatpush3.msra.mxu0 %v1108_v44 }
 0x3b1   : > { %2001 = vmatprep.subr.mxu0 %v2550_v23 }
 0x3b3   : > { %v1205_v45 = vpop.permute.xlu0 %1204 }
 0x3b5   : > { %v2986_v46 = vpop.eup %2203 }
 0x3b6   : > { %1985 = vmatmul.mubr.msk.f32.vlgmr.msra.gmra.mxu1 %vm922_vm4, %v2986_v46  ;;  %v929_v28 = vsel %vm922_vm4, %v2986_v46, 0.0 }
 0x3b7   : > { %1988 = vmatpush3.xpose.msk.msra.mxu1 %vm842_vm2, %v1019_v42  ;;  %v1203_v48 = vpop.permute.xlu0 %1202  ;;  %1991 = vmatprep.mubr.msk.f32.mxu1 %vm2551_vm1, %v2550_v23 }
 0x3b8   : > { %1989 = vmatprep.subr.mxu1 %v2550_v23 }
 0x3bb   : > { %1990 = vmatpush3.xpose.msk.msra.mxu1 %vm842_vm2, %v1017_v47  ;;  %v1199_v49 = vpop.permute.xlu0 %1198 }
 0x3bc   : > { %2008 = vmatprep.subr.mxu1 %v2550_v23 }
 0x3be   : > { %1992 = vmatmul.mubr.msk.f32.vlgmr.msra.gmra.mxu1 %vm842_vm2, %v1013_v50 }
 0x3bf   : > { %v1296_v51 = vpop.permute.xlu0 %1295  ;;  %2012 = vmatprep.mubr.msk.f32.mxu1 %vm2551_vm1, %v2550_v23 }
 0x3c0   : > { %2009 = vmatpush3.msra.mxu1 %v1296_v51 }
 0x3c1   : > { %2010 = vmatprep.subr.mxu1 %v2550_v23 }
 0x3c3   : > { %v1391_v9 = vpop.permute.xlu0 %1390 }
 0x3c7   : > { %v1389_v11 = vpop.permute.xlu0 %1388 }
 0x3cb   : > { %v1385_v12 = vpop.permute.xlu0 %1384 }
 0x476   : > { %v3000_v52 = vpop.f32.mrf.mxu1 }
 0x478   : > { %v1986_v53 = vpop.f32.mrf.mxu1 }
 0x47e   : > { %v1092_v54 = vpop.f32.mrf.mxu1 }
 0x47f   : > { %v1096_v55 = vsel %vm922_vm4, %v1092_v54, -inf }
 0x480   : > { %1097 = vmax.xlane.f32.xlu1 %v1096_v55  ;;  %v1993_v56 = vpop.f32.mrf.mxu1 }
 0x509   : > { %v1098_v57 = vpop.xlane.xlu1 %1097 }
 0x50a   : > { %v1099_v58 = vsub.f32 %v1092_v54, %v1098_v57 }
 0x50c   : > { %v1100_v59 = vmul.f32 1.442695, %v1099_v58 }
 0x50e   : > { %2205 = vpow2.f32 %v1100_v59 }
 0x51b   : > { %v2206_v60 = vpop.eup %2205 }
 0x51c   : > { %1999 = vmatmul.mubr.msk.f32.vlgmr.msra.gmra.mxu0 %vm922_vm4, %v2206_v60  ;;  %v1102_v2 = vsel %vm922_vm4, %v2206_v60, 0.0 }
 0x51d   : > { %2002 = vmatpush3.xpose.msk.msra.mxu0 %vm842_vm2, %v1205_v45  ;;  %2005 = vmatprep.mubr.msk.f32.mxu0 %vm2551_vm1, %v2550_v23 }
 0x51e   : > { %2003 = vmatprep.subr.mxu0 %v2550_v23 }
 0x521   : > { %2004 = vmatpush3.xpose.msk.msra.mxu0 %vm842_vm2, %v1203_v48 }
 0x522   : > { %2022 = vmatprep.subr.mxu0 %v2550_v23 }
 0x524   : > { %2006 = vmatmul.mubr.msk.f32.vlgmr.msra.gmra.mxu0 %vm842_vm2, %v1199_v49 }
 0x525   : > { %2026 = vmatprep.mubr.msk.f32.mxu0 %vm2551_vm1, %v2550_v23 }
 0x5dc   : > { %v1182_v61 = vpop.f32.mrf.mxu0 }
 0x5de   : > { %v2000_v62 = vpop.f32.mrf.mxu0 }
 0x5e4   : > { %v1278_v63 = vpop.f32.mrf.mxu0 }
 0x5e5   : > { %v1282_v0 = vsel %vm922_vm4, %v1278_v63, -inf }
 0x5e6   : > { %1283 = vmax.xlane.f32.xlu1 %v1282_v0  ;;  %v2007_v1 = vpop.f32.mrf.mxu0 }
 0x5f7   : > { %1293 = vrot.lane.b32.xlu1 %v2966_v35, %s2553_s20  ;;  %s1653_s20 = scalar_lea.sflag [#allocation7], %s2883_s23 }
 0x5fb   : > { %1481 = vrot.lane.b32.xlu1 %v2962_v34, %s2554_s8 }
 0x5ff   : > { %1479 = vrot.lane.b32.xlu1 %v2966_v35, %s2554_s8  ;;  %s2407_s8 = scalar_lea.vmem %s1669_s6, 128 }
 0x600   : > { %p2408_p5 = scmp.ne.s32.totalorder %s1669_s6, %s2407_s8 }
 0x602   : > { %p2409_p12 = pnand %p2408_p5, %p3200_p4 }
 0x604   : > { %p2410_p0 = pneg %p2409_p12 }
 0x623   : > { %1103 = vadd.xlane.f32.xlu1 %v1102_v2 }
 0x66f   : > { %v1284_v3 = vpop.xlane.xlu1 %1283 }
 0x670   : > { %v1285_v4 = vsub.f32 %v1278_v63, %v1284_v3 }
 0x672   : > { %v1286_v5 = vmul.f32 1.442695, %v1285_v4 }
 0x673   : > { %v1294_v6 = vpop.permute.xlu1 %1293 }
 0x674   : > { %2207 = vpow2.f32 %v1286_v5  ;;  %2011 = vmatpush3.msra.mxu1 %v1294_v6 }
 0x675   : > { %2015 = vmatprep.subr.mxu1 %v2550_v23 }
 0x677   : > { %v1482_v7 = vpop.permute.xlu1 %1481 }
 0x678   : > { %2023 = vmatpush3.msra.mxu0 %v1482_v7 }
 0x679   : > { %2024 = vmatprep.subr.mxu0 %v2550_v23 }
 0x67b   : > { %v1480_v8 = vpop.permute.xlu1 %1479 }
 0x67c   : > { %2025 = vmatpush3.msra.mxu0 %v1480_v8 }
 0x67d   : > { %2029 = vmatprep.subr.mxu0 %v2550_v23 }
 0x681   : > { %v2208_v10 = vpop.eup %2207 }
 0x682   : > { %2013 = vmatmul.mubr.msk.f32.vlgmr.msra.gmra.mxu1 %vm922_vm4, %v2208_v10  ;;  %v1288_v18 = vsel %vm922_vm4, %v2208_v10, 0.0 }
 0x683   : > { %2016 = vmatpush3.xpose.msk.msra.mxu1 %vm842_vm2, %v1391_v9  ;;  %2019 = vmatprep.mubr.msk.f32.mxu1 %vm2551_vm1, %v2550_v23 }
 0x684   : > { %2017 = vmatprep.subr.mxu1 %v2550_v23 }
 0x687   : > { %2018 = vmatpush3.xpose.msk.msra.mxu1 %vm842_vm2, %v1389_v11 }
 0x68a   : > { %2020 = vmatmul.mubr.msk.f32.vlgmr.msra.gmra.mxu1 %vm842_vm2, %v1385_v12 }
 0x6ac   : > { %v1104_v29 = vpop.xlane.xlu1 %1103 }
 0x742   : > { %v1368_v13 = vpop.f32.mrf.mxu1 }
 0x744   : > { %v2014_v14 = vpop.f32.mrf.mxu1 }
 0x74a   : > { %v1464_v15 = vpop.f32.mrf.mxu1 }
 0x74b   : > { %v1468_v16 = vsel %vm922_vm4, %v1464_v15, -inf }
 0x74c   : > { %1469 = vmax.xlane.f32.xlu0 %v1468_v16  ;;  %v2021_v17 = vpop.f32.mrf.mxu1 }
 0x750   : > { %1289 = vadd.xlane.f32.xlu0 %v1288_v18 }
 0x7d5   : > { %v1470_v19 = vpop.xlane.xlu0 %1469 }
 0x7d6   : > { %v1471_v20 = vsub.f32 %v1464_v15, %v1470_v19 }
 0x7d8   : > { %v1472_v21 = vmul.f32 1.442695, %v1471_v20 }
 0x7d9   : > { %v1290_v22 = vpop.xlane.xlu0 %1289 }
 0x7da   : > { %2209 = vpow2.f32 %v1472_v21 }
 0x7db   : > { %2211 = vrcp.f32 %v1290_v22 }
 0x7dc   : > { %2213 = vrcp.f32 %v1104_v29 }
 0x7e7   : > { %v2210_v24 = vpop.eup %2209 }
 0x7e8   : > { %v2212_v25 = vpop.eup %2211  ;;  %2027 = vmatmul.mubr.msk.f32.vlgmr.msra.gmra.mxu0 %vm922_vm4, %v2210_v24  ;;  %v1474_v26 = vsel %vm922_vm4, %v2210_v24, 0.0 }
 0x7e9   : > { %1475 = vadd.xlane.f32.xlu0 %v1474_v26  ;;  %v1373_v27 = vmul.f32 %v2212_v25, %v1368_v13  ;;  %2037 = vmatprep.mubr.msk.f32.mxu0 %vm2551_vm1, %v2550_v23  ;;  %v2214_v30 = vpop.eup %2213 }
 0x7ea   : > { %v1187_v31 = vmul.f32 %v2214_v30, %v1182_v61  ;;  %2030 = vmatpush3.msra.mxu0 %v1570_v38 }
 0x7eb   : > { %1375 = vrot.lane.b32.xlu1 %v1373_v27, %s2555_s7  ;;  %2031 = vmatprep.subr.mxu0 %v2550_v23  ;;  %s2558_s7 = smov [#allocation17]  }
 0x7ec   : > { %2032 = vmatpush3.msra.mxu0 %v1569_v39 }
 0x7ed   : > { %930 = vadd.xlane.f32.xlu0 %v929_v28  ;;  %2033 = vmatprep.subr.mxu0 %v2550_v23 }
 0x7ee   : > { %2034 = vmatpush3.msra.mxu0 %v1568_v40 }
 0x7ef   : > { %2035 = vmatprep.subr.mxu0 %v2550_v23  ;;  %v1885_v23 = vld [vmem:[%s3198_s15] ss:$0 sm:$0xff] }
 0x7f0   : > { %2036 = vmatpush3.msra.mxu0 %v1567_v41 }
 0x803   : > { %1189 = vrot.lane.b32.xlu0 %v1187_v31, %s2556_s29  ;;  %s2411_s29 = sshll.u32 %s2558_s7, 4  ;;  %s2412_s29 = int_to_ptr.vmem [resolvable:$false] %s2411_s29 }
 0x804   : > { %s2413_s3 = scalar_lea.vmem %s2412_s29, 256  ;;  %p2414_p8 = scmp.lt.s32.totalorder %s1669_s6, %s2412_s29 }
 0x805   : > { %p2415_p1 = scmp.lt.s32.totalorder %s2413_s3, %s2407_s8 }
 0x807   : > { %p2416_p9 = por %p2415_p1, %p2414_p8 }
 0x809   : > { %p2417_p11 = pnand %p2416_p9, %p2410_p0 }
 0x85d   : > { %v1376_v37 = vpop.permute.xlu1 %1375 }
 0x872   : > { %v1476_v32 = vpop.xlane.xlu0 %1475 }
 0x876   : > { %v931_v33 = vpop.xlane.xlu0 %930 }
 0x877   : > { %2215 = vrcp.f32 %v931_v33 }
 0x878   : > { %2217 = vrcp.f32 %v1476_v32 }
 0x87a   : > { %v1190_v36 = vpop.permute.xlu0 %1189 }
 0x884   : > { %v2216_v34 = vpop.eup %2215 }
 0x885   : > { %v1006_v35 = vmul.f32 %v2216_v34, %v3000_v52  ;;  %v2218_v42 = vpop.eup %2217 }
 0x887   : > { %1007 = vst.msk [vmem:[#allocation4] sm:$0xff] %vm842_vm2, %v1006_v35 }
 0x888   : > { %1193 = vst.msk [vmem:[#allocation4] sm:$0xff] %vm1192_vm5, %v1190_v36 }
 0x889   : > { %1379 = vst.msk [vmem:[#allocation4] sm:$0xff] %vm1378_vm6, %v1376_v37 }
 0x8a8   : > { %v1554_v43 = vpop.f32.mrf.mxu0 }
 0x8a9   : > { %v1559_v44 = vmul.f32 %v2218_v42, %v1554_v43 }
 0x8aa   : > { %v2028_v45 = vpop.f32.mrf.mxu0 }
 0x8ab   : > { %1561 = vrot.lane.b32.xlu1 %v1559_v44, %s2557_s9 }
 0x91d   : > { %v1562_v46 = vpop.permute.xlu1 %1561 }
 0x91e   : > { %1565 = vst.msk [vmem:[#allocation4] sm:$0xff] %vm1564_vm7, %v1562_v46 }
 0x925   : > { %v1566_v47 = vld [vmem:[#allocation4] sm:$0xff] }
 0x926   : > { %2038 = vmatmul.mubr.msk.f32.vlgmr.msra.gmra.mxu0 %vm764_vm3, %v1566_v47 }
 0x9e6   : > { %v1647_v48 = vpop.f32.mrf.mxu0 }
 0x9e7   : > { %v1648_v49 = vadd.f32 %v1885_v23, %v1647_v48 }
 0x9e8   : > { %v2039_v50 = vpop.f32.mrf.mxu0 }
 0x9e9   : > { %1651 = vst.msk [vmem:[%s2911_s24] sm:$0xff] %vm764_vm3, %v1648_v49 }
 0x9ea   : > { %2420 = shalt.err (!%p2417_p11)
}
 0x9eb   : > { %s2421_s24 = scalar_lea.hbm %s3054_s17, 128  ;;  %s2425_s9 = scalar_lea.hbm %s3199_s4, 512 }
 0x9ec   : > { %p2422_p3 = scmp.ne.s32.totalorder %s3054_s17, %s2421_s24  ;;  %p2426_p2 = scmp.lt.s32.totalorder %s3054_s17, %s3199_s4 }
 0x9ed   : > { %p2427_p13 = scmp.lt.s32.totalorder %s2425_s9, %s2421_s24 }
 0x9ee   : > { %p2423_p7 = pnand %p2422_p3, %p3200_p4 }
 0x9ef   : > { %p2428_p6 = por %p2427_p13, %p2426_p2 }
 0x9f0   : > { %p2424_p10 = pneg %p2423_p7 }
 0x9f2   : > { %p2429_p5 = pnand %p2428_p6, %p2424_p10 }
 0x9f4   : > { %2432 = shalt.err (!%p2429_p5)
}
 0x9f5   : > { %2062 = dma.vmem_to_hbm [thread:$0]  (%p3200_p4), %s1669_s6, 128, %s3054_s17, %s1653_s20  }
 0x9f6 PF: > { %s3201_s18 = sld [smem:[#allocation24_spill]]  ;;  %p2100_p12 = scmp.ge.s32.totalorder %s2539_s27, 2 }
 0x9f7   : > { %p3202_p0 = scmp.ne.s32.totalorder %s3179_s30, 0 }
 0x9f9   : > { %p2088_p8 = pnand %p2100_p12, %p3202_p0 }
 0x9fb   : > { %p2089_p1 = pneg %p2088_p8 }
 0x9fc   : > { %s1680_s1 = sand.u32 1, %s3201_s18  }
 0x9fd   : > { %s1681_s15 = scalar_lea.sflag [#allocation7], %s1680_s1 }
 0x9fe   : > { %2494 = dma.done.wait (%p2089_p1), %s1681_s15, 128  }
 0x9ff   : > { %2496 = vsyncadd (%p2089_p1), %s1681_s15, 4294967168  ;;  %s32_s27 = sadd.s32 1, %s2539_s27   ;;  %s3203_s17 = sld [smem:[#allocation23_spill]] }
 0xa00   : > { %p29_p9 = scmp.ge.s32.totalorder %s32_s27, 6   ;;  %s3204_s12 = sld [smem:[#allocation29_spill]] }
 0xa01   : > { %s3205_s13 = sld [smem:[#allocation30_spill]]  ;;  %s3206_s18 = smov %s2507_s19 }
 0xa02   : > { %s3207_s19 = smov %s2831_s2  ;;  %s3208_s20 = smov %s2515_s21 }
 0xa03   : > { %s3209_s21 = smov %s2519_s22  ;;  %s3210_s22 = smov %s2834_s5 }
 0xa04   : > { %s3211_s23 = smov %s2531_s25  ;;  %s3212_s24 = smov %s2535_s26 }
 0xa05   :  { %31 = sbr.rel (!%p29_p9) target bundleno = 25 (0x19), region = 153 }
 0xa06   : > { %s3213_s25 = smov %s3204_s12 }
 0xa07   : > { %s3214_s26 = smov %s3205_s13 }
 0xa0a   :  { %1686 = vsyncpa [#allocation6], 1 }
 0xa0b   :  { %1688 = vsyncpa [#allocation6 + $0x1], 1 }
 0xa0c   :  { %1689 = vsyncpa [#allocation9], 1 }
 0xa0d   :  { %1691 = vsyncpa [#allocation9 + $0x1], 1 }
 0xa0e   :  { %1692 = vsyncpa [#allocation12], 1 }
 0xa0f   :  { %1693 = vsyncpa [#allocation15], 1 }
 0xa10   :  { %1694 = vsyncpa [#allocation7], 1 }
 0xa11   :  { %1696 = vsyncpa [#allocation7 + $0x1], 1 }

</bundles_post_ra>
